<compile_context>
chip_gen: v5e
topology: v5e:2x2
jax: 0.10.0
libtpu: 0.0.40
codegen_flags: <defaults>
</compile_context>

<pallas_src>
import functools

import jax
import jax.numpy as jnp
from jax import lax
from jax.experimental import pallas as pl
from jax.experimental.pallas import tpu as pltpu


def mha_kernel(x_ref, wqkv_ref, wp_ref, maskadd_ref, params_ref, o_ref, *,
               num_heads, head_size, mxu_dtype, eps):
    bblk, T, E = x_ref.shape
    H, hs = num_heads, head_size
    N = bblk * T

    # Flatten (batch, seq): leading-dim merge, layout preserving for T % 8 == 0.
    xf = x_ref[...].reshape(N, E)                       # fp32, kept for residual
    xm = xf.astype(mxu_dtype)                           # bf16 MXU operand

    # Single fused QKV projection: one wide MXU matmul, fp32 accumulation.
    qkv = jnp.dot(xm, wqkv_ref[...], preferred_element_type=jnp.float32)  # (N, 3E)

    # Mask broadcast hoisted out of the head loop (no repeated broadcast_in_dim).
    mask_b = jnp.broadcast_to(maskadd_ref[...], (bblk, T, T))

    vals = []
    for h in range(H):  # H is small -> static unroll
        # Static lane slices of the fused qkv (see header note on why the
        # batched-head dot_general variant is not used).
        q = qkv[:, h * hs:(h + 1) * hs].reshape(bblk, T, hs).astype(mxu_dtype)
        k = qkv[:, E + h * hs:E + (h + 1) * hs].reshape(bblk, T, hs).astype(mxu_dtype)
        v = qkv[:, 2 * E + h * hs:2 * E + (h + 1) * hs].reshape(bblk, T, hs)

        # NOTE: no 1/sqrt(head_size) scaling -- matches the PyTorch module.
        s = jnp.einsum('btd,bsd->bts', q, k,
                       preferred_element_type=jnp.float32)     # (bblk, T, T)
        s = s + mask_b

        m = jnp.max(s, axis=-1, keepdims=True)
        e = jnp.exp(s - m)
        l = jnp.sum(e, axis=-1, keepdims=True)                 # (bblk, T, 1)
        pv = jnp.einsum('bts,bsd->btd', e.astype(mxu_dtype), v.astype(mxu_dtype),
                        preferred_element_type=jnp.float32)    # (bblk, T, hs)
        # Deferred softmax normalisation: (T,hs) multiply, not a (T,T) divide.
        # (approx=True would move this onto the EUP on v6e/v7x; kept exact so
        #  the fp32 path holds 1e-4 tolerances.)
        pv = pv * pl.reciprocal(l, approx=False)
        vals.append(pv.reshape(N, hs))

    # torch.cat((val, values), -1) prepends each head: reverse the list and do
    # ONE lane concat, then ONE deep-K projection (K = E) against wp.
    values = jnp.concatenate(vals[::-1], axis=-1)               # (N, E)
    proj = jnp.dot(values.astype(mxu_dtype), wp_ref[...],
                   preferred_element_type=jnp.float32)          # (N, E)

    bp = params_ref[0:1, :]
    gamma = params_ref[1:2, :]
    beta = params_ref[2:3, :]
    out = proj + bp + xf                                        # residual in fp32

    # LayerNorm over last dim, two-pass variance (fp32, eps=1e-5).
    mean = jnp.mean(out, axis=-1, keepdims=True)
    ctr = out - mean
    var = jnp.mean(ctr * ctr, axis=-1, keepdims=True)
    nout = ctr * lax.rsqrt(var + eps) * gamma + beta

    # o_ref is (bblk, T, E) or lane-dense (bblk, T*E); reshape covers both.
    o_ref[...] = nout.reshape(o_ref.shape).astype(o_ref.dtype)


def multi_head_attention(x, wq, wk, wv, mask, wp, bp, gamma, beta, eps=1e-5,
                         batch_block=None, mxu_dtype=jnp.bfloat16):
    """x: (B,T,E); wq/wk/wv: (H,E,hs); mask: (T,T); wp: (E,E) in x@W form;
    bp/gamma/beta: (E,). mxu_dtype=jnp.float32 recovers bit-faithful fp32."""
    B, T, E = x.shape
    H, _, hs = wq.shape
    assert H * hs == E

    if batch_block is None:
        # >=2 grid steps so both v7x TensorCores get work on the "parallel"
        # batch axis; on v5e/v6e (1 TC) pass batch_block=B for the largest tile.
        batch_block = B // 2 if (B >= 2 and B % 2 == 0) else B
    bblk = batch_block
    assert B % bblk == 0

    # Fused QKV weight (E, 3E): within each E-wide third, head h occupies
    # columns [h*hs : (h+1)*hs]. Cast MXU operands to mxu_dtype host-side
    # (halves weight DMA/VMEM in the bf16 path).
    wq_f = jnp.transpose(wq, (1, 0, 2)).reshape(E, H * hs)
    wk_f = jnp.transpose(wk, (1, 0, 2)).reshape(E, H * hs)
    wv_f = jnp.transpose(wv, (1, 0, 2)).reshape(E, H * hs)
    wqkv = jnp.concatenate([wq_f, wk_f, wv_f], axis=1).astype(mxu_dtype)
    wp_m = wp.astype(mxu_dtype)

    # Additive mask: 0 where visible, -1e30 where masked (finite => no NaN).
    mask_add = jnp.where(mask == 0, jnp.float32(-1e30), jnp.float32(0.0))

    # Pack the three (E,) vectors into one (3, E) input (one DMA / BlockSpec).
    params = jnp.stack([bp, gamma, beta], axis=0).astype(jnp.float32)

    x = x.astype(jnp.float32)
    kernel = functools.partial(mha_kernel, num_heads=H, head_size=hs,
                               mxu_dtype=mxu_dtype, eps=eps)

    # Explicit VMEM budget (tiles double-buffered + constants + live intermediates).
    mxu_bytes = jnp.dtype(mxu_dtype).itemsize
    n = bblk * T
    est = (4 * (bblk * T * E * 4)                                   # x + out tiles (2 bufs each)
           + 2 * ((3 * E * E + E * E) * mxu_bytes + (T * T + 3 * E) * 4)
           + n * 3 * E * 4 + 2 * bblk * T * T * 4 + 3 * n * E * 4)
    vmem_limit = int(min(32 * 2 ** 20, max(4 * 2 ** 20, 4 * est)))

    # Lane-dense output only pays off when E itself is not a lane multiple.
    lane_dense_possible = (T * E) % 128 == 0 and E % 128 != 0

    def attempt(single_buffer_consts, lane_dense_out):
        const_kw = dict(pipeline_mode=pl.Buffered(1)) if single_buffer_consts else {}
        in_specs = [
            pl.BlockSpec((bblk, T, E), lambda b: (b, 0, 0)),            # x tile
            pl.BlockSpec((E, 3 * E), lambda b: (0, 0), **const_kw),     # fused QKV weight
            pl.BlockSpec((E, E), lambda b: (0, 0), **const_kw),         # projection weight
            pl.BlockSpec((T, T), lambda b: (0, 0), **const_kw),         # additive mask
            pl.BlockSpec((3, E), lambda b: (0, 0), **const_kw),         # bp/gamma/beta
        ]
        if lane_dense_out:
            out_shape = jax.ShapeDtypeStruct((B, T * E), x.dtype)
            out_spec = pl.BlockSpec((bblk, T * E), lambda b: (b, 0))
        else:
            out_shape = jax.ShapeDtypeStruct((B, T, E), x.dtype)
            out_spec = pl.BlockSpec((bblk, T, E), lambda b: (b, 0, 0))
        fn = pl.pallas_call(
            kernel,
            out_shape=out_shape,
            grid_spec=pltpu.PrefetchScalarGridSpec(
                num_scalar_prefetch=0,
                grid=(B // bblk,),
                in_specs=in_specs,
                out_specs=out_spec),
            compiler_params=pltpu.CompilerParams(
                dimension_semantics=("parallel",),
                vmem_limit_bytes=vmem_limit))
        out = jax.block_until_ready(fn(x, wqkv, wp_m, mask_add, params))
        return out.reshape(B, T, E) if lane_dense_out else out

    # Try the most optimised pipeline config first; silently drop Buffered(1)
    # single-buffering / the lane-dense output if this jax/Mosaic build
    # rejects them. The final config is the known-good baseline layout.
    configs = [(True, lane_dense_possible), (False, lane_dense_possible),
               (True, False), (False, False)]
    last_err = None
    for cfg in dict.fromkeys(configs):
        try:
            return attempt(*cfg)
        except Exception as e:  # noqa: BLE001 -- fall back to a safer pipeline config
            last_err = e
    raise last_err


def mha_reference(x, wq, wk, wv, mask, wp, bp, gamma, beta, eps=1e-5):
    """Pure-JAX fp32 reference mirroring the PyTorch forward (incl. reversed concat)."""
    H = wq.shape[0]
    values = None
    for h in range(H):
        q = x @ wq[h]
        k = x @ wk[h]
        v = x @ wv[h]
        s = q @ jnp.swapaxes(k, -1, -2)
        s = jnp.where(mask == 0, -jnp.inf, s)
        p = jax.nn.softmax(s, axis=-1)
        val = p @ v
        values = val if values is None else jnp.concatenate([val, values], axis=-1)
    out = values @ wp + bp + x
    mean = jnp.mean(out, axis=-1, keepdims=True)
    var = jnp.mean(jnp.square(out - mean), axis=-1, keepdims=True)
    return (out - mean) * lax.rsqrt(var + eps) * gamma + beta


if __name__ == "__main__":
    B, T, E, H = 2, 8, 32, 4
    hs = E // H

    key = jax.random.PRNGKey(0)
    kx, kq, kk, kv, kp, kb = jax.random.split(key, 6)

    def xavier(k, shape, fan_in, fan_out):
        bound = (6.0 / (fan_in + fan_out)) ** 0.5
        return jax.random.uniform(k, shape, jnp.float32, -bound, bound)

    x = jax.random.normal(kx, (B, T, E), jnp.float32)
    wq = xavier(kq, (H, E, hs), E, hs)
    wk = xavier(kk, (H, E, hs), E, hs)
    wv = xavier(kv, (H, E, hs), E, hs)
    wp = xavier(kp, (E, E), E, E)
    bp = jax.random.uniform(kb, (E,), jnp.float32, -1.0 / E ** 0.5, 1.0 / E ** 0.5)
    gamma = jnp.ones((E,), jnp.float32)   # LayerNorm defaults
    beta = jnp.zeros((E,), jnp.float32)

    # Causal mask (context_size == T); the module masks where mask == 0.
    mask = jnp.tril(jnp.ones((T, T), jnp.float32))

    ref = mha_reference(x, wq, wk, wv, mask, wp, bp, gamma, beta)

    # 1) Default performance path: bf16 MXU operands, fp32 accumulation.
    #    Checked against the fp32 reference at bf16-operand-level tolerance.
    out_bf16 = multi_head_attention(x, wq, wk, wv, mask, wp, bp, gamma, beta)
    out_bf16 = jax.block_until_ready(out_bf16)
    assert out_bf16.shape == (B, T, E)
    assert bool(jnp.all(jnp.isfinite(out_bf16)))
    assert jnp.allclose(out_bf16, ref, rtol=5e-2, atol=2e-1), "bf16 path diverged"

    # 2) Exact-semantics path: fp32 MXU operands, tight tolerance vs reference.
    out_f32 = multi_head_attention(x, wq, wk, wv, mask, wp, bp, gamma, beta,
                                   mxu_dtype=jnp.float32)
    out_f32 = jax.block_until_ready(out_f32)
    assert jnp.allclose(out_f32, ref, rtol=1e-4, atol=1e-4), "fp32 mismatch vs reference"

    print("KERNEL_OK")
</pallas_src>

<mosaic_0001>
module attributes {stable_mosaic.version = 11 : i64} {
  func.func @mha_kernel(%arg0: i32, %arg1: memref<1x8x32xf32, #tpu.memory_space<vmem>>, %arg2: memref<32x96xbf16, #tpu.memory_space<vmem>>, %arg3: memref<32x32xbf16, #tpu.memory_space<vmem>>, %arg4: memref<8x8xf32, #tpu.memory_space<vmem>>, %arg5: memref<3x32xf32, #tpu.memory_space<vmem>>, %arg6: memref<1x8x32xf32, #tpu.memory_space<vmem>>) attributes {dimension_semantics = [#tpu.dimension_semantics<parallel>], iteration_bounds = array<i64: 2>, scalar_prefetch = 0 : i64, scratch_operands = 0 : i64, tpu.core_type = #tpu.core_type<tc>, window_params = [{transform_indices = @transform_0, window_bounds = array<i64: 1, 8, 32>}, {pipeline_mode = #tpu.pipeline_mode<synchronous>, transform_indices = @transform_1, window_bounds = array<i64: 32, 96>}, {pipeline_mode = #tpu.pipeline_mode<synchronous>, transform_indices = @transform_2, window_bounds = array<i64: 32, 32>}, {pipeline_mode = #tpu.pipeline_mode<synchronous>, transform_indices = @transform_3, window_bounds = array<i64: 8, 8>}, {pipeline_mode = #tpu.pipeline_mode<synchronous>, transform_indices = @transform_4, window_bounds = array<i64: 3, 32>}, {transform_indices = @transform_5, window_bounds = array<i64: 1, 8, 32>}]} {
    %c0 = arith.constant 0 : index
    %c0_0 = arith.constant 0 : index
    %c0_1 = arith.constant 0 : index
    %0 = vector.load %arg1[%c0, %c0_0, %c0_1] : memref<1x8x32xf32, #tpu.memory_space<vmem>>, vector<1x8x32xf32>
    %1 = vector.shape_cast %0 : vector<1x8x32xf32> to vector<8x32xf32>
    %2 = arith.truncf %1 : vector<8x32xf32> to vector<8x32xbf16>
    %c0_2 = arith.constant 0 : index
    %c0_3 = arith.constant 0 : index
    %3 = vector.load %arg2[%c0_2, %c0_3] : memref<32x96xbf16, #tpu.memory_space<vmem>>, vector<32x96xbf16>
    %cst = arith.constant dense<0.000000e+00> : vector<8x96xf32>
    %4 = tpu.matmul %2, %3, %cst {dimension_numbers = #tpu.dot_dimension_numbers<[1], [0], [0], [1], [0, 0, 1, 1], [], []>} : vector<8x32xbf16>, vector<32x96xbf16>, vector<8x96xf32> -> vector<8x96xf32>
    %c0_4 = arith.constant 0 : index
    %c0_5 = arith.constant 0 : index
    %5 = vector.load %arg4[%c0_4, %c0_5] : memref<8x8xf32, #tpu.memory_space<vmem>>, vector<8x8xf32>
    %6 = vector.shape_cast %5 : vector<8x8xf32> to vector<1x8x8xf32>
    %7 = vector.extract_strided_slice %4 {offsets = [0, 0], sizes = [8, 8], strides = [1, 1]} : vector<8x96xf32> to vector<8x8xf32>
    %8 = vector.shape_cast %7 : vector<8x8xf32> to vector<1x8x8xf32>
    %9 = arith.truncf %8 : vector<1x8x8xf32> to vector<1x8x8xbf16>
    %10 = vector.extract_strided_slice %4 {offsets = [0, 32], sizes = [8, 8], strides = [1, 1]} : vector<8x96xf32> to vector<8x8xf32>
    %11 = vector.shape_cast %10 : vector<8x8xf32> to vector<1x8x8xf32>
    %12 = arith.truncf %11 : vector<1x8x8xf32> to vector<1x8x8xbf16>
    %13 = vector.extract_strided_slice %4 {offsets = [0, 64], sizes = [8, 8], strides = [1, 1]} : vector<8x96xf32> to vector<8x8xf32>
    %14 = vector.shape_cast %13 : vector<8x8xf32> to vector<1x8x8xf32>
    "tpu.trace_start"() <{level = 10 : i32, message = "btd,bsd->bts"}> : () -> ()
    %cst_6 = arith.constant dense<0.000000e+00> : vector<1x8x8xf32>
    %15 = tpu.matmul %9, %12, %cst_6 {dimension_numbers = #tpu.dot_dimension_numbers<[2], [2], [1], [1], [0, 0, 0, 1, 1, 1], [0], [0]>} : vector<1x8x8xbf16>, vector<1x8x8xbf16>, vector<1x8x8xf32> -> vector<1x8x8xf32>
    "tpu.trace_stop"() : () -> ()
    %16 = arith.addf %15, %6 : vector<1x8x8xf32>
    %cst_7 = arith.constant dense<0xFF800000> : vector<1x8xf32>
    %17 = vector.multi_reduction <maximumf>, %16, %cst_7 [2] : vector<1x8x8xf32> to vector<1x8xf32>
    %18 = vector.shape_cast %17 : vector<1x8xf32> to vector<1x8x1xf32>
    %19 = vector.broadcast %18 : vector<1x8x1xf32> to vector<1x8x8xf32>
    %20 = arith.subf %16, %19 : vector<1x8x8xf32>
    %21 = math.exp %20 : vector<1x8x8xf32>
    %cst_8 = arith.constant dense<0.000000e+00> : vector<1x8xf32>
    %22 = vector.multi_reduction <add>, %21, %cst_8 [2] : vector<1x8x8xf32> to vector<1x8xf32>
    %23 = vector.shape_cast %22 : vector<1x8xf32> to vector<1x8x1xf32>
    %24 = arith.truncf %21 : vector<1x8x8xf32> to vector<1x8x8xbf16>
    %25 = arith.truncf %14 : vector<1x8x8xf32> to vector<1x8x8xbf16>
    "tpu.trace_start"() <{level = 10 : i32, message = "bts,bsd->btd"}> : () -> ()
    %cst_9 = arith.constant dense<0.000000e+00> : vector<1x8x8xf32>
    %26 = tpu.matmul %24, %25, %cst_9 {dimension_numbers = #tpu.dot_dimension_numbers<[2], [1], [1], [2], [0, 0, 0, 1, 1, 2], [0], [0]>} : vector<1x8x8xbf16>, vector<1x8x8xbf16>, vector<1x8x8xf32> -> vector<1x8x8xf32>
    "tpu.trace_stop"() : () -> ()
    %27 = tpu.reciprocal %23 : vector<1x8x1xf32> -> vector<1x8x1xf32>
    %28 = vector.broadcast %27 : vector<1x8x1xf32> to vector<1x8x8xf32>
    %29 = arith.mulf %26, %28 : vector<1x8x8xf32>
    %30 = vector.shape_cast %29 : vector<1x8x8xf32> to vector<8x8xf32>
    %31 = vector.extract_strided_slice %4 {offsets = [0, 8], sizes = [8, 8], strides = [1, 1]} : vector<8x96xf32> to vector<8x8xf32>
    %32 = vector.shape_cast %31 : vector<8x8xf32> to vector<1x8x8xf32>
    %33 = arith.truncf %32 : vector<1x8x8xf32> to vector<1x8x8xbf16>
    %34 = vector.extract_strided_slice %4 {offsets = [0, 40], sizes = [8, 8], strides = [1, 1]} : vector<8x96xf32> to vector<8x8xf32>
    %35 = vector.shape_cast %34 : vector<8x8xf32> to vector<1x8x8xf32>
    %36 = arith.truncf %35 : vector<1x8x8xf32> to vector<1x8x8xbf16>
    %37 = vector.extract_strided_slice %4 {offsets = [0, 72], sizes = [8, 8], strides = [1, 1]} : vector<8x96xf32> to vector<8x8xf32>
    %38 = vector.shape_cast %37 : vector<8x8xf32> to vector<1x8x8xf32>
    "tpu.trace_start"() <{level = 10 : i32, message = "btd,bsd->bts"}> : () -> ()
    %cst_10 = arith.constant dense<0.000000e+00> : vector<1x8x8xf32>
    %39 = tpu.matmul %33, %36, %cst_10 {dimension_numbers = #tpu.dot_dimension_numbers<[2], [2], [1], [1], [0, 0, 0, 1, 1, 1], [0], [0]>} : vector<1x8x8xbf16>, vector<1x8x8xbf16>, vector<1x8x8xf32> -> vector<1x8x8xf32>
    "tpu.trace_stop"() : () -> ()
    %40 = arith.addf %39, %6 : vector<1x8x8xf32>
    %cst_11 = arith.constant dense<0xFF800000> : vector<1x8xf32>
    %41 = vector.multi_reduction <maximumf>, %40, %cst_11 [2] : vector<1x8x8xf32> to vector<1x8xf32>
    %42 = vector.shape_cast %41 : vector<1x8xf32> to vector<1x8x1xf32>
    %43 = vector.broadcast %42 : vector<1x8x1xf32> to vector<1x8x8xf32>
    %44 = arith.subf %40, %43 : vector<1x8x8xf32>
    %45 = math.exp %44 : vector<1x8x8xf32>
    %cst_12 = arith.constant dense<0.000000e+00> : vector<1x8xf32>
    %46 = vector.multi_reduction <add>, %45, %cst_12 [2] : vector<1x8x8xf32> to vector<1x8xf32>
    %47 = vector.shape_cast %46 : vector<1x8xf32> to vector<1x8x1xf32>
    %48 = arith.truncf %45 : vector<1x8x8xf32> to vector<1x8x8xbf16>
    %49 = arith.truncf %38 : vector<1x8x8xf32> to vector<1x8x8xbf16>
    "tpu.trace_start"() <{level = 10 : i32, message = "bts,bsd->btd"}> : () -> ()
    %cst_13 = arith.constant dense<0.000000e+00> : vector<1x8x8xf32>
    %50 = tpu.matmul %48, %49, %cst_13 {dimension_numbers = #tpu.dot_dimension_numbers<[2], [1], [1], [2], [0, 0, 0, 1, 1, 2], [0], [0]>} : vector<1x8x8xbf16>, vector<1x8x8xbf16>, vector<1x8x8xf32> -> vector<1x8x8xf32>
    "tpu.trace_stop"() : () -> ()
    %51 = tpu.reciprocal %47 : vector<1x8x1xf32> -> vector<1x8x1xf32>
    %52 = vector.broadcast %51 : vector<1x8x1xf32> to vector<1x8x8xf32>
    %53 = arith.mulf %50, %52 : vector<1x8x8xf32>
    %54 = vector.shape_cast %53 : vector<1x8x8xf32> to vector<8x8xf32>
    %55 = vector.extract_strided_slice %4 {offsets = [0, 16], sizes = [8, 8], strides = [1, 1]} : vector<8x96xf32> to vector<8x8xf32>
    %56 = vector.shape_cast %55 : vector<8x8xf32> to vector<1x8x8xf32>
    %57 = arith.truncf %56 : vector<1x8x8xf32> to vector<1x8x8xbf16>
    %58 = vector.extract_strided_slice %4 {offsets = [0, 48], sizes = [8, 8], strides = [1, 1]} : vector<8x96xf32> to vector<8x8xf32>
    %59 = vector.shape_cast %58 : vector<8x8xf32> to vector<1x8x8xf32>
    %60 = arith.truncf %59 : vector<1x8x8xf32> to vector<1x8x8xbf16>
    %61 = vector.extract_strided_slice %4 {offsets = [0, 80], sizes = [8, 8], strides = [1, 1]} : vector<8x96xf32> to vector<8x8xf32>
    %62 = vector.shape_cast %61 : vector<8x8xf32> to vector<1x8x8xf32>
    "tpu.trace_start"() <{level = 10 : i32, message = "btd,bsd->bts"}> : () -> ()
    %cst_14 = arith.constant dense<0.000000e+00> : vector<1x8x8xf32>
    %63 = tpu.matmul %57, %60, %cst_14 {dimension_numbers = #tpu.dot_dimension_numbers<[2], [2], [1], [1], [0, 0, 0, 1, 1, 1], [0], [0]>} : vector<1x8x8xbf16>, vector<1x8x8xbf16>, vector<1x8x8xf32> -> vector<1x8x8xf32>
    "tpu.trace_stop"() : () -> ()
    %64 = arith.addf %63, %6 : vector<1x8x8xf32>
    %cst_15 = arith.constant dense<0xFF800000> : vector<1x8xf32>
    %65 = vector.multi_reduction <maximumf>, %64, %cst_15 [2] : vector<1x8x8xf32> to vector<1x8xf32>
    %66 = vector.shape_cast %65 : vector<1x8xf32> to vector<1x8x1xf32>
    %67 = vector.broadcast %66 : vector<1x8x1xf32> to vector<1x8x8xf32>
    %68 = arith.subf %64, %67 : vector<1x8x8xf32>
    %69 = math.exp %68 : vector<1x8x8xf32>
    %cst_16 = arith.constant dense<0.000000e+00> : vector<1x8xf32>
    %70 = vector.multi_reduction <add>, %69, %cst_16 [2] : vector<1x8x8xf32> to vector<1x8xf32>
    %71 = vector.shape_cast %70 : vector<1x8xf32> to vector<1x8x1xf32>
    %72 = arith.truncf %69 : vector<1x8x8xf32> to vector<1x8x8xbf16>
    %73 = arith.truncf %62 : vector<1x8x8xf32> to vector<1x8x8xbf16>
    "tpu.trace_start"() <{level = 10 : i32, message = "bts,bsd->btd"}> : () -> ()
    %cst_17 = arith.constant dense<0.000000e+00> : vector<1x8x8xf32>
    %74 = tpu.matmul %72, %73, %cst_17 {dimension_numbers = #tpu.dot_dimension_numbers<[2], [1], [1], [2], [0, 0, 0, 1, 1, 2], [0], [0]>} : vector<1x8x8xbf16>, vector<1x8x8xbf16>, vector<1x8x8xf32> -> vector<1x8x8xf32>
    "tpu.trace_stop"() : () -> ()
    %75 = tpu.reciprocal %71 : vector<1x8x1xf32> -> vector<1x8x1xf32>
    %76 = vector.broadcast %75 : vector<1x8x1xf32> to vector<1x8x8xf32>
    %77 = arith.mulf %74, %76 : vector<1x8x8xf32>
    %78 = vector.shape_cast %77 : vector<1x8x8xf32> to vector<8x8xf32>
    %79 = vector.extract_strided_slice %4 {offsets = [0, 24], sizes = [8, 8], strides = [1, 1]} : vector<8x96xf32> to vector<8x8xf32>
    %80 = vector.shape_cast %79 : vector<8x8xf32> to vector<1x8x8xf32>
    %81 = arith.truncf %80 : vector<1x8x8xf32> to vector<1x8x8xbf16>
    %82 = vector.extract_strided_slice %4 {offsets = [0, 56], sizes = [8, 8], strides = [1, 1]} : vector<8x96xf32> to vector<8x8xf32>
    %83 = vector.shape_cast %82 : vector<8x8xf32> to vector<1x8x8xf32>
    %84 = arith.truncf %83 : vector<1x8x8xf32> to vector<1x8x8xbf16>
    %85 = vector.extract_strided_slice %4 {offsets = [0, 88], sizes = [8, 8], strides = [1, 1]} : vector<8x96xf32> to vector<8x8xf32>
    %86 = vector.shape_cast %85 : vector<8x8xf32> to vector<1x8x8xf32>
    "tpu.trace_start"() <{level = 10 : i32, message = "btd,bsd->bts"}> : () -> ()
    %cst_18 = arith.constant dense<0.000000e+00> : vector<1x8x8xf32>
    %87 = tpu.matmul %81, %84, %cst_18 {dimension_numbers = #tpu.dot_dimension_numbers<[2], [2], [1], [1], [0, 0, 0, 1, 1, 1], [0], [0]>} : vector<1x8x8xbf16>, vector<1x8x8xbf16>, vector<1x8x8xf32> -> vector<1x8x8xf32>
    "tpu.trace_stop"() : () -> ()
    %88 = arith.addf %87, %6 : vector<1x8x8xf32>
    %cst_19 = arith.constant dense<0xFF800000> : vector<1x8xf32>
    %89 = vector.multi_reduction <maximumf>, %88, %cst_19 [2] : vector<1x8x8xf32> to vector<1x8xf32>
    %90 = vector.shape_cast %89 : vector<1x8xf32> to vector<1x8x1xf32>
    %91 = vector.broadcast %90 : vector<1x8x1xf32> to vector<1x8x8xf32>
    %92 = arith.subf %88, %91 : vector<1x8x8xf32>
    %93 = math.exp %92 : vector<1x8x8xf32>
    %cst_20 = arith.constant dense<0.000000e+00> : vector<1x8xf32>
    %94 = vector.multi_reduction <add>, %93, %cst_20 [2] : vector<1x8x8xf32> to vector<1x8xf32>
    %95 = vector.shape_cast %94 : vector<1x8xf32> to vector<1x8x1xf32>
    %96 = arith.truncf %93 : vector<1x8x8xf32> to vector<1x8x8xbf16>
    %97 = arith.truncf %86 : vector<1x8x8xf32> to vector<1x8x8xbf16>
    "tpu.trace_start"() <{level = 10 : i32, message = "bts,bsd->btd"}> : () -> ()
    %cst_21 = arith.constant dense<0.000000e+00> : vector<1x8x8xf32>
    %98 = tpu.matmul %96, %97, %cst_21 {dimension_numbers = #tpu.dot_dimension_numbers<[2], [1], [1], [2], [0, 0, 0, 1, 1, 2], [0], [0]>} : vector<1x8x8xbf16>, vector<1x8x8xbf16>, vector<1x8x8xf32> -> vector<1x8x8xf32>
    "tpu.trace_stop"() : () -> ()
    %99 = tpu.reciprocal %95 : vector<1x8x1xf32> -> vector<1x8x1xf32>
    %100 = vector.broadcast %99 : vector<1x8x1xf32> to vector<1x8x8xf32>
    %101 = arith.mulf %98, %100 : vector<1x8x8xf32>
    %102 = vector.shape_cast %101 : vector<1x8x8xf32> to vector<8x8xf32>
    %103 = tpu.concatenate %102, %78, %54, %30 in 1 : vector<8x8xf32>, vector<8x8xf32>, vector<8x8xf32>, vector<8x8xf32> -> vector<8x32xf32>
    %104 = arith.truncf %103 : vector<8x32xf32> to vector<8x32xbf16>
    %c0_22 = arith.constant 0 : index
    %c0_23 = arith.constant 0 : index
    %105 = vector.load %arg3[%c0_22, %c0_23] : memref<32x32xbf16, #tpu.memory_space<vmem>>, vector<32x32xbf16>
    %cst_24 = arith.constant dense<0.000000e+00> : vector<8x32xf32>
    %106 = tpu.matmul %104, %105, %cst_24 {dimension_numbers = #tpu.dot_dimension_numbers<[1], [0], [0], [1], [0, 0, 1, 1], [], []>} : vector<8x32xbf16>, vector<32x32xbf16>, vector<8x32xf32> -> vector<8x32xf32>
    %c0_25 = arith.constant 0 : index
    %c0_26 = arith.constant 0 : index
    %107 = vector.load %arg5[%c0_25, %c0_26] : memref<3x32xf32, #tpu.memory_space<vmem>>, vector<1x32xf32>
    %c1 = arith.constant 1 : index
    %c0_27 = arith.constant 0 : index
    %108 = vector.load %arg5[%c1, %c0_27] : memref<3x32xf32, #tpu.memory_space<vmem>>, vector<1x32xf32>
    %c2 = arith.constant 2 : index
    %c0_28 = arith.constant 0 : index
    %109 = vector.load %arg5[%c2, %c0_28] : memref<3x32xf32, #tpu.memory_space<vmem>>, vector<1x32xf32>
    %110 = vector.broadcast %107 : vector<1x32xf32> to vector<8x32xf32>
    %111 = arith.addf %106, %110 : vector<8x32xf32>
    %112 = arith.addf %111, %1 : vector<8x32xf32>
    %cst_29 = arith.constant dense<0.000000e+00> : vector<8xf32>
    %113 = vector.multi_reduction <add>, %112, %cst_29 [1] : vector<8x32xf32> to vector<8xf32>
    %114 = vector.shape_cast %113 : vector<8xf32> to vector<8x1xf32>
    %cst_30 = arith.constant 3.200000e+01 : f32
    %115 = vector.broadcast %cst_30 : f32 to vector<8x1xf32>
    %116 = arith.divf %114, %115 : vector<8x1xf32>
    %117 = vector.broadcast %116 : vector<8x1xf32> to vector<8x32xf32>
    %118 = arith.subf %112, %117 : vector<8x32xf32>
    %119 = arith.mulf %118, %118 : vector<8x32xf32>
    %cst_31 = arith.constant dense<0.000000e+00> : vector<8xf32>
    %120 = vector.multi_reduction <add>, %119, %cst_31 [1] : vector<8x32xf32> to vector<8xf32>
    %121 = vector.shape_cast %120 : vector<8xf32> to vector<8x1xf32>
    %cst_32 = arith.constant 3.200000e+01 : f32
    %122 = vector.broadcast %cst_32 : f32 to vector<8x1xf32>
    %123 = arith.divf %121, %122 : vector<8x1xf32>
    %cst_33 = arith.constant 9.99999974E-6 : f32
    %124 = vector.broadcast %cst_33 : f32 to vector<8x1xf32>
    %125 = arith.addf %123, %124 : vector<8x1xf32>
    %126 = math.rsqrt %125 : vector<8x1xf32>
    %127 = vector.broadcast %126 : vector<8x1xf32> to vector<8x32xf32>
    %128 = arith.mulf %118, %127 : vector<8x32xf32>
    %129 = vector.broadcast %108 : vector<1x32xf32> to vector<8x32xf32>
    %130 = arith.mulf %128, %129 : vector<8x32xf32>
    %131 = vector.broadcast %109 : vector<1x32xf32> to vector<8x32xf32>
    %132 = arith.addf %130, %131 : vector<8x32xf32>
    %133 = vector.shape_cast %132 : vector<8x32xf32> to vector<1x8x32xf32>
    %c0_34 = arith.constant 0 : index
    %c0_35 = arith.constant 0 : index
    %c0_36 = arith.constant 0 : index
    %134 = vector.load %arg6[%c0_34, %c0_35, %c0_36] : memref<1x8x32xf32, #tpu.memory_space<vmem>>, vector<1x8x32xf32>
    tpu.vector_store %arg6[%c0_34, %c0_35, %c0_36], %133 {strides = array<i32>} : memref<1x8x32xf32, #tpu.memory_space<vmem>>, vector<1x8x32xf32>,
    return
  }
  func.func @transform_0(%arg0: i32) -> (i32, i32, i32) {
    %c0_i32 = arith.constant 0 : i32
    %c0_i32_0 = arith.constant 0 : i32
    %c0_i32_1 = arith.constant 0 : i32
    return %arg0, %c0_i32, %c0_i32_0 : i32, i32, i32
  }
  func.func @transform_1(%arg0: i32) -> (i32, i32) {
    %c0_i32 = arith.constant 0 : i32
    %c0_i32_0 = arith.constant 0 : i32
    %c0_i32_1 = arith.constant 0 : i32
    return %c0_i32, %c0_i32_0 : i32, i32
  }
  func.func @transform_2(%arg0: i32) -> (i32, i32) {
    %c0_i32 = arith.constant 0 : i32
    %c0_i32_0 = arith.constant 0 : i32
    %c0_i32_1 = arith.constant 0 : i32
    return %c0_i32, %c0_i32_0 : i32, i32
  }
  func.func @transform_3(%arg0: i32) -> (i32, i32) {
    %c0_i32 = arith.constant 0 : i32
    %c0_i32_0 = arith.constant 0 : i32
    %c0_i32_1 = arith.constant 0 : i32
    return %c0_i32, %c0_i32_0 : i32, i32
  }
  func.func @transform_4(%arg0: i32) -> (i32, i32) {
    %c0_i32 = arith.constant 0 : i32
    %c0_i32_0 = arith.constant 0 : i32
    %c0_i32_1 = arith.constant 0 : i32
    return %c0_i32, %c0_i32_0 : i32, i32
  }
  func.func @transform_5(%arg0: i32) -> (i32, i32, i32) {
    %c0_i32 = arith.constant 0 : i32
    %c0_i32_0 = arith.constant 0 : i32
    %c0_i32_1 = arith.constant 0 : i32
    return %arg0, %c0_i32, %c0_i32_0 : i32, i32, i32
  }
}

module attributes {stable_mosaic.version = 11 : i64} {
  func.func @mha_kernel(%arg0: i32, %arg1: memref<1x8x32xf32, #tpu.memory_space<vmem>>, %arg2: memref<32x96xbf16, #tpu.memory_space<vmem>>, %arg3: memref<32x32xbf16, #tpu.memory_space<vmem>>, %arg4: memref<8x8xf32, #tpu.memory_space<vmem>>, %arg5: memref<3x32xf32, #tpu.memory_space<vmem>>, %arg6: memref<1x8x32xf32, #tpu.memory_space<vmem>>) attributes {dimension_semantics = [#tpu.dimension_semantics<parallel>], iteration_bounds = array<i64: 2>, scalar_prefetch = 0 : i64, scratch_operands = 0 : i64, tpu.core_type = #tpu.core_type<tc>, window_params = [{transform_indices = @transform_0, window_bounds = array<i64: 1, 8, 32>}, {pipeline_mode = #tpu.pipeline_mode<synchronous>, transform_indices = @transform_1, window_bounds = array<i64: 32, 96>}, {pipeline_mode = #tpu.pipeline_mode<synchronous>, transform_indices = @transform_2, window_bounds = array<i64: 32, 32>}, {pipeline_mode = #tpu.pipeline_mode<synchronous>, transform_indices = @transform_3, window_bounds = array<i64: 8, 8>}, {pipeline_mode = #tpu.pipeline_mode<synchronous>, transform_indices = @transform_4, window_bounds = array<i64: 3, 32>}, {transform_indices = @transform_5, window_bounds = array<i64: 1, 8, 32>}]} {
    %c0 = arith.constant 0 : index
    %c0_0 = arith.constant 0 : index
    %c0_1 = arith.constant 0 : index
    %0 = vector.load %arg1[%c0, %c0_0, %c0_1] : memref<1x8x32xf32, #tpu.memory_space<vmem>>, vector<1x8x32xf32>
    %1 = vector.shape_cast %0 : vector<1x8x32xf32> to vector<8x32xf32>
    %2 = arith.truncf %1 : vector<8x32xf32> to vector<8x32xbf16>
    %c0_2 = arith.constant 0 : index
    %c0_3 = arith.constant 0 : index
    %3 = vector.load %arg2[%c0_2, %c0_3] : memref<32x96xbf16, #tpu.memory_space<vmem>>, vector<32x96xbf16>
    %cst = arith.constant dense<0.000000e+00> : vector<8x96xf32>
    %4 = tpu.matmul %2, %3, %cst {dimension_numbers = #tpu.dot_dimension_numbers<[1], [0], [0], [1], [0, 0, 1, 1], [], []>} : vector<8x32xbf16>, vector<32x96xbf16>, vector<8x96xf32> -> vector<8x96xf32>
    %c0_4 = arith.constant 0 : index
    %c0_5 = arith.constant 0 : index
    %5 = vector.load %arg4[%c0_4, %c0_5] : memref<8x8xf32, #tpu.memory_space<vmem>>, vector<8x8xf32>
    %6 = vector.shape_cast %5 : vector<8x8xf32> to vector<1x8x8xf32>
    %7 = vector.extract_strided_slice %4 {offsets = [0, 0], sizes = [8, 8], strides = [1, 1]} : vector<8x96xf32> to vector<8x8xf32>
    %8 = vector.shape_cast %7 : vector<8x8xf32> to vector<1x8x8xf32>
    %9 = arith.truncf %8 : vector<1x8x8xf32> to vector<1x8x8xbf16>
    %10 = vector.extract_strided_slice %4 {offsets = [0, 32], sizes = [8, 8], strides = [1, 1]} : vector<8x96xf32> to vector<8x8xf32>
    %11 = vector.shape_cast %10 : vector<8x8xf32> to vector<1x8x8xf32>
    %12 = arith.truncf %11 : vector<1x8x8xf32> to vector<1x8x8xbf16>
    %13 = vector.extract_strided_slice %4 {offsets = [0, 64], sizes = [8, 8], strides = [1, 1]} : vector<8x96xf32> to vector<8x8xf32>
    %14 = vector.shape_cast %13 : vector<8x8xf32> to vector<1x8x8xf32>
    "tpu.trace_start"() <{level = 10 : i32, message = "btd,bsd->bts"}> : () -> ()
    %cst_6 = arith.constant dense<0.000000e+00> : vector<1x8x8xf32>
    %15 = tpu.matmul %9, %12, %cst_6 {dimension_numbers = #tpu.dot_dimension_numbers<[2], [2], [1], [1], [0, 0, 0, 1, 1, 1], [0], [0]>} : vector<1x8x8xbf16>, vector<1x8x8xbf16>, vector<1x8x8xf32> -> vector<1x8x8xf32>
    "tpu.trace_stop"() : () -> ()
    %16 = arith.addf %15, %6 : vector<1x8x8xf32>
    %cst_7 = arith.constant dense<0xFF800000> : vector<1x8xf32>
    %17 = vector.multi_reduction <maximumf>, %16, %cst_7 [2] : vector<1x8x8xf32> to vector<1x8xf32>
    %18 = vector.shape_cast %17 : vector<1x8xf32> to vector<1x8x1xf32>
    %19 = vector.broadcast %18 : vector<1x8x1xf32> to vector<1x8x8xf32>
    %20 = arith.subf %16, %19 : vector<1x8x8xf32>
    %21 = math.exp %20 : vector<1x8x8xf32>
    %cst_8 = arith.constant dense<0.000000e+00> : vector<1x8xf32>
    %22 = vector.multi_reduction <add>, %21, %cst_8 [2] : vector<1x8x8xf32> to vector<1x8xf32>
    %23 = vector.shape_cast %22 : vector<1x8xf32> to vector<1x8x1xf32>
    %24 = arith.truncf %21 : vector<1x8x8xf32> to vector<1x8x8xbf16>
    %25 = arith.truncf %14 : vector<1x8x8xf32> to vector<1x8x8xbf16>
    "tpu.trace_start"() <{level = 10 : i32, message = "bts,bsd->btd"}> : () -> ()
    %cst_9 = arith.constant dense<0.000000e+00> : vector<1x8x8xf32>
    %26 = tpu.matmul %24, %25, %cst_9 {dimension_numbers = #tpu.dot_dimension_numbers<[2], [1], [1], [2], [0, 0, 0, 1, 1, 2], [0], [0]>} : vector<1x8x8xbf16>, vector<1x8x8xbf16>, vector<1x8x8xf32> -> vector<1x8x8xf32>
    "tpu.trace_stop"() : () -> ()
    %27 = tpu.reciprocal %23 : vector<1x8x1xf32> -> vector<1x8x1xf32>
    %28 = vector.broadcast %27 : vector<1x8x1xf32> to vector<1x8x8xf32>
    %29 = arith.mulf %26, %28 : vector<1x8x8xf32>
    %30 = vector.shape_cast %29 : vector<1x8x8xf32> to vector<8x8xf32>
    %31 = vector.extract_strided_slice %4 {offsets = [0, 8], sizes = [8, 8], strides = [1, 1]} : vector<8x96xf32> to vector<8x8xf32>
    %32 = vector.shape_cast %31 : vector<8x8xf32> to vector<1x8x8xf32>
    %33 = arith.truncf %32 : vector<1x8x8xf32> to vector<1x8x8xbf16>
    %34 = vector.extract_strided_slice %4 {offsets = [0, 40], sizes = [8, 8], strides = [1, 1]} : vector<8x96xf32> to vector<8x8xf32>
    %35 = vector.shape_cast %34 : vector<8x8xf32> to vector<1x8x8xf32>
    %36 = arith.truncf %35 : vector<1x8x8xf32> to vector<1x8x8xbf16>
    %37 = vector.extract_strided_slice %4 {offsets = [0, 72], sizes = [8, 8], strides = [1, 1]} : vector<8x96xf32> to vector<8x8xf32>
    %38 = vector.shape_cast %37 : vector<8x8xf32> to vector<1x8x8xf32>
    "tpu.trace_start"() <{level = 10 : i32, message = "btd,bsd->bts"}> : () -> ()
    %cst_10 = arith.constant dense<0.000000e+00> : vector<1x8x8xf32>
    %39 = tpu.matmul %33, %36, %cst_10 {dimension_numbers = #tpu.dot_dimension_numbers<[2], [2], [1], [1], [0, 0, 0, 1, 1, 1], [0], [0]>} : vector<1x8x8xbf16>, vector<1x8x8xbf16>, vector<1x8x8xf32> -> vector<1x8x8xf32>
    "tpu.trace_stop"() : () -> ()
    %40 = arith.addf %39, %6 : vector<1x8x8xf32>
    %cst_11 = arith.constant dense<0xFF800000> : vector<1x8xf32>
    %41 = vector.multi_reduction <maximumf>, %40, %cst_11 [2] : vector<1x8x8xf32> to vector<1x8xf32>
    %42 = vector.shape_cast %41 : vector<1x8xf32> to vector<1x8x1xf32>
    %43 = vector.broadcast %42 : vector<1x8x1xf32> to vector<1x8x8xf32>
    %44 = arith.subf %40, %43 : vector<1x8x8xf32>
    %45 = math.exp %44 : vector<1x8x8xf32>
    %cst_12 = arith.constant dense<0.000000e+00> : vector<1x8xf32>
    %46 = vector.multi_reduction <add>, %45, %cst_12 [2] : vector<1x8x8xf32> to vector<1x8xf32>
    %47 = vector.shape_cast %46 : vector<1x8xf32> to vector<1x8x1xf32>
    %48 = arith.truncf %45 : vector<1x8x8xf32> to vector<1x8x8xbf16>
    %49 = arith.truncf %38 : vector<1x8x8xf32> to vector<1x8x8xbf16>
    "tpu.trace_start"() <{level = 10 : i32, message = "bts,bsd->btd"}> : () -> ()
    %cst_13 = arith.constant dense<0.000000e+00> : vector<1x8x8xf32>
    %50 = tpu.matmul %48, %49, %cst_13 {dimension_numbers = #tpu.dot_dimension_numbers<[2], [1], [1], [2], [0, 0, 0, 1, 1, 2], [0], [0]>} : vector<1x8x8xbf16>, vector<1x8x8xbf16>, vector<1x8x8xf32> -> vector<1x8x8xf32>
    "tpu.trace_stop"() : () -> ()
    %51 = tpu.reciprocal %47 : vector<1x8x1xf32> -> vector<1x8x1xf32>
    %52 = vector.broadcast %51 : vector<1x8x1xf32> to vector<1x8x8xf32>
    %53 = arith.mulf %50, %52 : vector<1x8x8xf32>
    %54 = vector.shape_cast %53 : vector<1x8x8xf32> to vector<8x8xf32>
    %55 = vector.extract_strided_slice %4 {offsets = [0, 16], sizes = [8, 8], strides = [1, 1]} : vector<8x96xf32> to vector<8x8xf32>
    %56 = vector.shape_cast %55 : vector<8x8xf32> to vector<1x8x8xf32>
    %57 = arith.truncf %56 : vector<1x8x8xf32> to vector<1x8x8xbf16>
    %58 = vector.extract_strided_slice %4 {offsets = [0, 48], sizes = [8, 8], strides = [1, 1]} : vector<8x96xf32> to vector<8x8xf32>
    %59 = vector.shape_cast %58 : vector<8x8xf32> to vector<1x8x8xf32>
    %60 = arith.truncf %59 : vector<1x8x8xf32> to vector<1x8x8xbf16>
    %61 = vector.extract_strided_slice %4 {offsets = [0, 80], sizes = [8, 8], strides = [1, 1]} : vector<8x96xf32> to vector<8x8xf32>
    %62 = vector.shape_cast %61 : vector<8x8xf32> to vector<1x8x8xf32>
    "tpu.trace_start"() <{level = 10 : i32, message = "btd,bsd->bts"}> : () -> ()
    %cst_14 = arith.constant dense<0.000000e+00> : vector<1x8x8xf32>
    %63 = tpu.matmul %57, %60, %cst_14 {dimension_numbers = #tpu.dot_dimension_numbers<[2], [2], [1], [1], [0, 0, 0, 1, 1, 1], [0], [0]>} : vector<1x8x8xbf16>, vector<1x8x8xbf16>, vector<1x8x8xf32> -> vector<1x8x8xf32>
    "tpu.trace_stop"() : () -> ()
    %64 = arith.addf %63, %6 : vector<1x8x8xf32>
    %cst_15 = arith.constant dense<0xFF800000> : vector<1x8xf32>
    %65 = vector.multi_reduction <maximumf>, %64, %cst_15 [2] : vector<1x8x8xf32> to vector<1x8xf32>
    %66 = vector.shape_cast %65 : vector<1x8xf32> to vector<1x8x1xf32>
    %67 = vector.broadcast %66 : vector<1x8x1xf32> to vector<1x8x8xf32>
    %68 = arith.subf %64, %67 : vector<1x8x8xf32>
    %69 = math.exp %68 : vector<1x8x8xf32>
    %cst_16 = arith.constant dense<0.000000e+00> : vector<1x8xf32>
    %70 = vector.multi_reduction <add>, %69, %cst_16 [2] : vector<1x8x8xf32> to vector<1x8xf32>
    %71 = vector.shape_cast %70 : vector<1x8xf32> to vector<1x8x1xf32>
    %72 = arith.truncf %69 : vector<1x8x8xf32> to vector<1x8x8xbf16>
    %73 = arith.truncf %62 : vector<1x8x8xf32> to vector<1x8x8xbf16>
    "tpu.trace_start"() <{level = 10 : i32, message = "bts,bsd->btd"}> : () -> ()
    %cst_17 = arith.constant dense<0.000000e+00> : vector<1x8x8xf32>
    %74 = tpu.matmul %72, %73, %cst_17 {dimension_numbers = #tpu.dot_dimension_numbers<[2], [1], [1], [2], [0, 0, 0, 1, 1, 2], [0], [0]>} : vector<1x8x8xbf16>, vector<1x8x8xbf16>, vector<1x8x8xf32> -> vector<1x8x8xf32>
    "tpu.trace_stop"() : () -> ()
    %75 = tpu.reciprocal %71 : vector<1x8x1xf32> -> vector<1x8x1xf32>
    %76 = vector.broadcast %75 : vector<1x8x1xf32> to vector<1x8x8xf32>
    %77 = arith.mulf %74, %76 : vector<1x8x8xf32>
    %78 = vector.shape_cast %77 : vector<1x8x8xf32> to vector<8x8xf32>
    %79 = vector.extract_strided_slice %4 {offsets = [0, 24], sizes = [8, 8], strides = [1, 1]} : vector<8x96xf32> to vector<8x8xf32>
    %80 = vector.shape_cast %79 : vector<8x8xf32> to vector<1x8x8xf32>
    %81 = arith.truncf %80 : vector<1x8x8xf32> to vector<1x8x8xbf16>
    %82 = vector.extract_strided_slice %4 {offsets = [0, 56], sizes = [8, 8], strides = [1, 1]} : vector<8x96xf32> to vector<8x8xf32>
    %83 = vector.shape_cast %82 : vector<8x8xf32> to vector<1x8x8xf32>
    %84 = arith.truncf %83 : vector<1x8x8xf32> to vector<1x8x8xbf16>
    %85 = vector.extract_strided_slice %4 {offsets = [0, 88], sizes = [8, 8], strides = [1, 1]} : vector<8x96xf32> to vector<8x8xf32>
    %86 = vector.shape_cast %85 : vector<8x8xf32> to vector<1x8x8xf32>
    "tpu.trace_start"() <{level = 10 : i32, message = "btd,bsd->bts"}> : () -> ()
    %cst_18 = arith.constant dense<0.000000e+00> : vector<1x8x8xf32>
    %87 = tpu.matmul %81, %84, %cst_18 {dimension_numbers = #tpu.dot_dimension_numbers<[2], [2], [1], [1], [0, 0, 0, 1, 1, 1], [0], [0]>} : vector<1x8x8xbf16>, vector<1x8x8xbf16>, vector<1x8x8xf32> -> vector<1x8x8xf32>
    "tpu.trace_stop"() : () -> ()
    %88 = arith.addf %87, %6 : vector<1x8x8xf32>
    %cst_19 = arith.constant dense<0xFF800000> : vector<1x8xf32>
    %89 = vector.multi_reduction <maximumf>, %88, %cst_19 [2] : vector<1x8x8xf32> to vector<1x8xf32>
    %90 = vector.shape_cast %89 : vector<1x8xf32> to vector<1x8x1xf32>
    %91 = vector.broadcast %90 : vector<1x8x1xf32> to vector<1x8x8xf32>
    %92 = arith.subf %88, %91 : vector<1x8x8xf32>
    %93 = math.exp %92 : vector<1x8x8xf32>
    %cst_20 = arith.constant dense<0.000000e+00> : vector<1x8xf32>
    %94 = vector.multi_reduction <add>, %93, %cst_20 [2] : vector<1x8x8xf32> to vector<1x8xf32>
    %95 = vector.shape_cast %94 : vector<1x8xf32> to vector<1x8x1xf32>
    %96 = arith.truncf %93 : vector<1x8x8xf32> to vector<1x8x8xbf16>
    %97 = arith.truncf %86 : vector<1x8x8xf32> to vector<1x8x8xbf16>
    "tpu.trace_start"() <{level = 10 : i32, message = "bts,bsd->btd"}> : () -> ()
    %cst_21 = arith.constant dense<0.000000e+00> : vector<1x8x8xf32>
    %98 = tpu.matmul %96, %97, %cst_21 {dimension_numbers = #tpu.dot_dimension_numbers<[2], [1], [1], [2], [0, 0, 0, 1, 1, 2], [0], [0]>} : vector<1x8x8xbf16>, vector<1x8x8xbf16>, vector<1x8x8xf32> -> vector<1x8x8xf32>
    "tpu.trace_stop"() : () -> ()
    %99 = tpu.reciprocal %95 : vector<1x8x1xf32> -> vector<1x8x1xf32>
    %100 = vector.broadcast %99 : vector<1x8x1xf32> to vector<1x8x8xf32>
    %101 = arith.mulf %98, %100 : vector<1x8x8xf32>
    %102 = vector.shape_cast %101 : vector<1x8x8xf32> to vector<8x8xf32>
    %103 = tpu.concatenate %102, %78, %54, %30 in 1 : vector<8x8xf32>, vector<8x8xf32>, vector<8x8xf32>, vector<8x8xf32> -> vector<8x32xf32>
    %104 = arith.truncf %103 : vector<8x32xf32> to vector<8x32xbf16>
    %c0_22 = arith.constant 0 : index
    %c0_23 = arith.constant 0 : index
    %105 = vector.load %arg3[%c0_22, %c0_23] : memref<32x32xbf16, #tpu.memory_space<vmem>>, vector<32x32xbf16>
    %cst_24 = arith.constant dense<0.000000e+00> : vector<8x32xf32>
    %106 = tpu.matmul %104, %105, %cst_24 {dimension_numbers = #tpu.dot_dimension_numbers<[1], [0], [0], [1], [0, 0, 1, 1], [], []>} : vector<8x32xbf16>, vector<32x32xbf16>, vector<8x32xf32> -> vector<8x32xf32>
    %c0_25 = arith.constant 0 : index
    %c0_26 = arith.constant 0 : index
    %107 = vector.load %arg5[%c0_25, %c0_26] : memref<3x32xf32, #tpu.memory_space<vmem>>, vector<1x32xf32>
    %c1 = arith.constant 1 : index
    %c0_27 = arith.constant 0 : index
    %108 = vector.load %arg5[%c1, %c0_27] : memref<3x32xf32, #tpu.memory_space<vmem>>, vector<1x32xf32>
    %c2 = arith.constant 2 : index
    %c0_28 = arith.constant 0 : index
    %109 = vector.load %arg5[%c2, %c0_28] : memref<3x32xf32, #tpu.memory_space<vmem>>, vector<1x32xf32>
    %110 = vector.broadcast %107 : vector<1x32xf32> to vector<8x32xf32>
    %111 = arith.addf %106, %110 : vector<8x32xf32>
    %112 = arith.addf %111, %1 : vector<8x32xf32>
    %cst_29 = arith.constant dense<0.000000e+00> : vector<8xf32>
    %113 = vector.multi_reduction <add>, %112, %cst_29 [1] : vector<8x32xf32> to vector<8xf32>
    %114 = vector.shape_cast %113 : vector<8xf32> to vector<8x1xf32>
    %cst_30 = arith.constant 3.200000e+01 : f32
    %115 = vector.broadcast %cst_30 : f32 to vector<8x1xf32>
    %116 = arith.divf %114, %115 : vector<8x1xf32>
    %117 = vector.broadcast %116 : vector<8x1xf32> to vector<8x32xf32>
    %118 = arith.subf %112, %117 : vector<8x32xf32>
    %119 = arith.mulf %118, %118 : vector<8x32xf32>
    %cst_31 = arith.constant dense<0.000000e+00> : vector<8xf32>
    %120 = vector.multi_reduction <add>, %119, %cst_31 [1] : vector<8x32xf32> to vector<8xf32>
    %121 = vector.shape_cast %120 : vector<8xf32> to vector<8x1xf32>
    %cst_32 = arith.constant 3.200000e+01 : f32
    %122 = vector.broadcast %cst_32 : f32 to vector<8x1xf32>
    %123 = arith.divf %121, %122 : vector<8x1xf32>
    %cst_33 = arith.constant 9.99999974E-6 : f32
    %124 = vector.broadcast %cst_33 : f32 to vector<8x1xf32>
    %125 = arith.addf %123, %124 : vector<8x1xf32>
    %126 = math.rsqrt %125 : vector<8x1xf32>
    %127 = vector.broadcast %126 : vector<8x1xf32> to vector<8x32xf32>
    %128 = arith.mulf %118, %127 : vector<8x32xf32>
    %129 = vector.broadcast %108 : vector<1x32xf32> to vector<8x32xf32>
    %130 = arith.mulf %128, %129 : vector<8x32xf32>
    %131 = vector.broadcast %109 : vector<1x32xf32> to vector<8x32xf32>
    %132 = arith.addf %130, %131 : vector<8x32xf32>
    %133 = vector.shape_cast %132 : vector<8x32xf32> to vector<1x8x32xf32>
    %c0_34 = arith.constant 0 : index
    %c0_35 = arith.constant 0 : index
    %c0_36 = arith.constant 0 : index
    %134 = vector.load %arg6[%c0_34, %c0_35, %c0_36] : memref<1x8x32xf32, #tpu.memory_space<vmem>>, vector<1x8x32xf32>
    tpu.vector_store %arg6[%c0_34, %c0_35, %c0_36], %133 {strides = array<i32>} : memref<1x8x32xf32, #tpu.memory_space<vmem>>, vector<1x8x32xf32>,
    return
  }
  func.func @transform_0(%arg0: i32) -> (i32, i32, i32) {
    %c0_i32 = arith.constant 0 : i32
    %c0_i32_0 = arith.constant 0 : i32
    %c0_i32_1 = arith.constant 0 : i32
    return %arg0, %c0_i32, %c0_i32_0 : i32, i32, i32
  }
  func.func @transform_1(%arg0: i32) -> (i32, i32) {
    %c0_i32 = arith.constant 0 : i32
    %c0_i32_0 = arith.constant 0 : i32
    %c0_i32_1 = arith.constant 0 : i32
    return %c0_i32, %c0_i32_0 : i32, i32
  }
  func.func @transform_2(%arg0: i32) -> (i32, i32) {
    %c0_i32 = arith.constant 0 : i32
    %c0_i32_0 = arith.constant 0 : i32
    %c0_i32_1 = arith.constant 0 : i32
    return %c0_i32, %c0_i32_0 : i32, i32
  }
  func.func @transform_3(%arg0: i32) -> (i32, i32) {
    %c0_i32 = arith.constant 0 : i32
    %c0_i32_0 = arith.constant 0 : i32
    %c0_i32_1 = arith.constant 0 : i32
    return %c0_i32, %c0_i32_0 : i32, i32
  }
  func.func @transform_4(%arg0: i32) -> (i32, i32) {
    %c0_i32 = arith.constant 0 : i32
    %c0_i32_0 = arith.constant 0 : i32
    %c0_i32_1 = arith.constant 0 : i32
    return %c0_i32, %c0_i32_0 : i32, i32
  }
  func.func @transform_5(%arg0: i32) -> (i32, i32, i32) {
    %c0_i32 = arith.constant 0 : i32
    %c0_i32_0 = arith.constant 0 : i32
    %c0_i32_1 = arith.constant 0 : i32
    return %arg0, %c0_i32, %c0_i32_0 : i32, i32, i32
  }
}

</mosaic_0001>

<bundles_post_ra>
// kernel: tpu_custom_call.1
= control target key start
LH: loop header
LB: loop body
LE: loop exit
PB: predicated region body
PF: predicated region fallthrough
CT: control target
= control target key end

     0   :  { %10 = vsyncpa [#allocation3], 0  ;;  %s1507_s0 = inlined_call_operand.hbm [shape: f32[2,8,32], index: 0, kind: input, shape index: {}]   ;;  %s1508_s1 = inlined_call_operand.hbm [shape: bf16[32,96], index: 1, kind: input, shape index: {}]   ;;  %s1509_s2 = inlined_call_operand.hbm [shape: bf16[32,32], index: 2, kind: input, shape index: {}]   ;;  %s1510_s3 = inlined_call_operand.hbm [shape: f32[8,8], index: 3, kind: input, shape index: {}]   ;;  %s1511_s4 = inlined_call_operand.hbm [shape: f32[3,32], index: 4, kind: input, shape index: {}]   ;;  %s1512_s5 = inlined_call_operand.hbm [shape: f32[2,8,32], index: 5, kind: output, shape index: {}]  }
   0x1   :  { %12 = vsyncpa [#allocation3 + $0x1], 0 }
   0x2   :  { %13 = vsyncpa [#allocation6], 0 }
   0x3   :  { %14 = vsyncpa [#allocation9], 0 }
   0x4   :  { %15 = vsyncpa [#allocation4], 0 }
   0x5   :  { %17 = vsyncpa [#allocation4 + $0x1], 0  ;;  %s1288_s18 = smov 0   ;;  %s1290_s19 = smov 0  }
   0x6   :  { %s1292_s20 = smov 0   ;;  %s1294_s21 = smov 0  }
   0x7 LB: > { %s175_s24 = sshll.u32 %s1508_s1, 4  ;;  %s1312_s25 = sadd.s32 4294967295, %s1235_s21   ;;  %s1235_s21 = sphi %s1294_s21, %s1524_s21   ;;  %s1231_s20 = sphi %s1292_s20, %s1523_s20   ;;  %s1227_s19 = sphi %s1290_s19, %s1522_s19   ;;  %s1223_s18 = sphi %s1288_s18, %s1521_s18   ;;  %s176_s24 = int_to_ptr.hbm [resolvable:$true] %s175_s24 }
   0x8   : > { %p835_p0 = scmp.ge.s32.totalorder %s1235_s21, 1  ;;  %p44_p1 = scmp.eq.s32.totalorder %s1312_s25, 0 }
   0x9   : > { %p164_p2 = scmp.lt.s32.totalorder %s1235_s21, 3  ;;  %s1237_s27 = smov [#allocation5]  }
   0xa   : > { %s177_s28 = sshll.u32 %s1237_s27, 4  ;;  %s204_s6 = sshll.u32 %s1510_s3, 4  ;;  %s178_s28 = int_to_ptr.vmem [resolvable:$true] %s177_s28  ;;  %s205_s6 = int_to_ptr.hbm [resolvable:$true] %s204_s6 }
   0xb   : > { %p1317_p3 = pnand %p835_p0, %p164_p2  ;;  %s189_s10 = sshll.u32 %s1509_s2, 4  ;;  %s190_s10 = int_to_ptr.hbm [resolvable:$true] %s189_s10 }
   0xc   : > { %s1238_s11 = smov [#allocation8]   ;;  %s1239_s13 = smov 64  }
   0xd   : > { %p904_p4 = pneg %p1317_p3  ;;  %s206_s12 = sshll.u32 %s1238_s11, 4  ;;  %s207_s12 = int_to_ptr.vmem [resolvable:$true] %s206_s12 }
   0xe   : > { %s1240_s14 = smov 4   ;;  %s216_s17 = sshll.u32 %s1511_s4, 4  ;;  %s217_s17 = int_to_ptr.hbm [resolvable:$true] %s216_s17 }
   0xf   : > { %p1329_p6 = pnand %p904_p4, %p44_p1  ;;  %s1241_s22 = smov [#allocation7]  }
  0x10   : > { %s191_s23 = sshll.u32 %s1241_s22, 4  ;;  %s1349_s29 = sadd.s32 1, %s1235_s21   ;;  %s192_s23 = int_to_ptr.vmem [resolvable:$true] %s191_s23 }
  0x11   : > { %907 = dma.hbm_to_vmem [thread:$0]  (!%p1329_p6), %s176_s24, 256, %s178_s28, [#allocation6], %s1239_s13, %s1239_s13, %s1240_s14  }
  0x12   : > { %913 = dma.hbm_to_vmem [thread:$0]  (!%p1329_p6), %s205_s6, 128, %s207_s12, [#allocation9]  }
  0x13   : > { %910 = dma.hbm_to_vmem [thread:$0]  (!%p1329_p6), %s190_s10, 256, %s192_s23, [#allocation6], %s1239_s13, %s1239_s13, %s1240_s14  }
  0x14   : > { %s1242_s24 = smov [#allocation10]   ;;  %s834_s28 = sadd.s32 4294967294, %s1235_s21  }
  0x15   : > { %s218_s27 = sshll.u32 %s1242_s24, 4  ;;  %s27_s30 = ssub.s32 %s1235_s21, %s1349_s29  ;;  %s219_s27 = int_to_ptr.vmem [resolvable:$true] %s218_s27 }
  0x16   : > { %916 = dma.hbm_to_vmem [thread:$0]  (!%p1329_p6), %s217_s17, 64, %s219_s27, [#allocation9]  }
  0x17   : > { %s30_s6 = sadd.s32 1, %s1231_s20  ;;  %p28_p7 = scmp.eq.s32.totalorder %s27_s30, 0 }
  0x18   : > { %p37_p8 = scmp.ne.s32.totalorder %s1231_s20, %s1227_s19  ;;  %p38_p9 = scmp.eq.s32.totalorder %s1235_s21, 0 }
  0x19   : > { %p43_p10 = scmp.ne.s32.totalorder %s1227_s19, %s1223_s18  ;;  %p151_p13 = scmp.eq.s32.totalorder %s1312_s25, 1 }
  0x1a   : > { %s1360_s8 = scalar_select %p28_p7, %s1231_s20, %s30_s6  }
  0x1b   : > { %p1362_p11 = por %p38_p9, %p37_p8  ;;  %p1368_p12 = por %p44_p1, %p43_p10 }
  0x1c   : > { %p157_p0 = scmp.eq.s32.totalorder %s834_s28, 1  ;;  %p929_p2 = scmp.lt.s32.totalorder %s1235_s21, 2 }
  0x1d   : > { %s229_s10 = sand.u32 1, %s1231_s20   ;;  %p1375_p4 = por %p151_p13, %p37_p8 }
  0x1e   : > { %p1379_p6 = por %p157_p0, %p43_p10  ;;  %s841_s13 = sshll.u32 %s229_s10, 3 }
  0x1f   : > { %s842_s14 = sshll.u32 %s1235_s21, 3  ;;  %s233_s22 = scalar_lea.vmem [#allocation2], %s841_s13 }
  0x20   : > { %s237_s17 = scalar_lea.hbm %s1507_s0, %s842_s14  ;;  %s241_s23 = sshll.u32 %s233_s22, 4  ;;  %s242_s23 = int_to_ptr.vmem [resolvable:$true] %s241_s23 }
  0x21   : > { %s239_s24 = sshll.u32 %s237_s17, 4  ;;  %p1389_p7 = pnand %p929_p2, %p1362_p11  ;;  %s240_s24 = int_to_ptr.hbm [resolvable:$true] %s239_s24 }
  0x22   : > { %s230_s28 = scalar_lea.sflag [#allocation3], %s229_s10  ;;  %s1131_s30 = sshra.s32 %s240_s24, 4  ;;  %s1132_s30 = int_to_ptr.hbm [resolvable:$true] %s1131_s30 }
  0x23   : > { %s1133_s6 = scalar_lea.hbm %s1132_s30, 8  ;;  %p1135_p9 = pneg %p1389_p7 }
  0x24   : > { %p1134_p8 = scmp.ne.s32.totalorder %s1132_s30, %s1133_s6  ;;  %s1138_s15 = scalar_lea.hbm %s1507_s0, 16 }
  0x25   : > { %p1139_p11 = scmp.lt.s32.totalorder %s1132_s30, %s1507_s0  ;;  %p1140_p0 = scmp.lt.s32.totalorder %s1138_s15, %s1133_s6 }
  0x26   : > { %p1136_p10 = pnand %p1135_p9, %p1134_p8 }
  0x27   : > { %p1141_p2 = por %p1140_p0, %p1139_p11 }
  0x28   : > { %p1137_p13 = pneg %p1136_p10 }
  0x2a   : > { %p1142_p5 = pnand %p1141_p2, %p1137_p13 }
  0x2c   : > { %1145 = shalt.err (!%p1142_p5)
}
  0x2d   : > { %920 = dma.hbm_to_vmem [thread:$0]  (!%p1389_p7), %s240_s24, 128, %s242_s23, %s230_s28  }
  0x2e   : > { %250 = sbr.rel (%p1317_p3) target bundleno = 1248 (0x4e0), region = 40  ;;  %s1406_s10 = sand.u32 (!%p1317_p3), 1, %s1227_s19  }
  0x2f   : > { %s844_s17 = sshll.u32 (!%p1317_p3), %s1406_s10, 3  ;;  %s253_s22 = scalar_lea.sflag (!%p1317_p3), [#allocation3], %s1406_s10 }
  0x30   : > { %s256_s30 = scalar_lea.vmem (!%p1317_p3), [#allocation2], %s844_s17 }
  0x33   : > { %1206 = dma.done.wait (%p1368_p12), %s253_s22, 128  }
  0x34   : > { %1208 = vsyncadd (%p1368_p12), %s253_s22, 4294967168 }
  0x35   : > { %1210 = dma.done.wait (%p44_p1), [#allocation6], 512  }
  0x36   : > { %1212 = vsyncadd (%p44_p1), [#allocation6], 4294966784 }
  0x37   : > { %1214 = dma.done.wait (%p44_p1), [#allocation9], 192  }
  0x38   : > { %1216 = vsyncadd (%p44_p1), [#allocation9], 4294967104  ;;  %v881_v0 = vld [vmem:[#allocation5 + $0x8] sm:$0xff]  ;;  %v880_v1 = vld [vmem:[#allocation5] sm:$0xff]  ;;  %vm323_vm0 = vcmask 261120   ;;  %s1243_s26 = smov 112  }
  0x39   : > { %333 = vmatpush.bf16.msra.mxu0 %v881_v0  ;;  %v1424_v2 = vld [vmem:[%s256_s30] sm:$0xff]  ;;  %s1244_s7 = smov 120   ;;  %s1245_s23 = smov 96   ;;  %vm382_vm1 = vcmask 1043456   ;;  %vm347_vm2 = vcmask 64512   ;;  %v340_v22 = vld [vmem:[#allocation8] sm:$0xff] }
  0x3a   : > { %v306_v3 = vpack.c.bf16 %v1424_v2, %v1424_v2  ;;  %s1246_s24 = smov 72   ;;  %s1247_s27 = smov 80  }
  0x3b   : > { %s1248_s28 = smov 88   ;;  %s1249_s6 = smov 64  }
  0x3c   : > { %s1250_s13 = smov 104   ;;  %s1251_s14 = smov 56  }
  0x3d   : > { %334 = vmatpush.bf16.msra.mxu0 %v880_v1  ;;  %s1252_s15 = smov 48   ;;  %s1253_s16 = smov 40  }
  0x3e   : > { %s1254_s9 = smov 24   ;;  %s1255_s22 = smov 8  }
  0x3f   : > { %s1256_s30 = smov 16  }
  0x40   : > { %858 = vmatmul.msk.bf16.vlgmr.msra.gmra.mxu0 %vm323_vm0, %v306_v3 }
  0xbd   : > { %v336_v4 = vpop.f32.mrf.mxu0 }
  0xbe   : > { %v341_v5 = vpack.c.bf16 %v336_v4, %v336_v4 }
  0xc0   : > { %v343_v6 = vunpack.c.l.b16 %v341_v5 }
  0xc2   : > { %v1429_v7 = vpack.c.b16 %v343_v6, %v343_v6 }
  0xc4   : > { %483 = vrot.lane.b32.xlu2 %v1429_v7, %s1243_s26  ;;  %414 = vrot.lane.b32.xlu1 %v1429_v7, %s1244_s7  ;;  %s877_s26 = sshll.u32 %s1312_s25, 3  ;;  %s711_s25 = scalar_lea.sflag [#allocation4], %s1406_s10 }
  0xc5   : > { %345 = vrot.lane.b32.xlu0 %v1429_v7, %s1245_s23  ;;  %v338_v8 = vpop.f32.mrf.mxu0 }
  0xcc   : > { %554 = vrot.lane.b32.xlu2 %v1429_v7, %s1246_s24  ;;  %485 = vrot.lane.b32.xlu1 %v1429_v7, %s1247_s27  ;;  %s721_s24 = scalar_lea.hbm %s1512_s5, %s877_s26  ;;  %s303_s27 = scalar_lea.vmem [#allocation11], %s844_s17 }
  0xcd   : > { %416 = vrot.lane.b32.xlu0 %v1429_v7, %s1248_s28  ;;  %s723_s28 = sshll.u32 %s303_s27, 4  ;;  %s1181_s17 = scalar_lea.hbm %s1512_s5, 16  ;;  %s724_s28 = int_to_ptr.vmem [resolvable:$true] %s723_s28 }
  0xd4   : > { %377 = vrot.lane.b32.xlu2 %v1429_v7, %s1249_s6  ;;  %s725_s6 = sshll.u32 %s721_s24, 4  ;;  %s726_s6 = int_to_ptr.hbm [resolvable:$true] %s725_s6 }
  0xd5   : > { %552 = vrot.lane.b32.xlu0 %v1429_v7, %s1250_s13  ;;  %s1175_s13 = sshra.s32 %s726_s6, 4  ;;  %s1176_s13 = int_to_ptr.hbm [resolvable:$true] %s1175_s13 }
  0xd6   : > { %p1182_p12 = scmp.lt.s32.totalorder %s1176_s13, %s1512_s5 }
 0x11e   : > { %v484_v9 = vpop.permute.xlu2 %483 }
 0x126   : > { %v555_v10 = vpop.permute.xlu2 %554 }
 0x127   : > { %v560_v20 = vsel %vm347_vm2, %v555_v10, 0 }
 0x12e   : > { %v378_v11 = vpop.permute.xlu2 %377 }
 0x12f   : > { %v384_v12 = vsel %vm382_vm1, %v378_v11, 0 }
 0x130   : > { %393 = vmatpush.bf16.msra.mxu2 %v384_v12 }
 0x136   : > { %v415_v13 = vpop.permute.xlu1 %414 }
 0x137   : > { %v346_v14 = vpop.permute.xlu0 %345 }
 0x138   : > { %v352_v15 = vsel %vm347_vm2, %v346_v14, 0 }
 0x139   : > { %361 = vmatpush.bf16.xpose.msra.mxu1 %v352_v15 }
 0x13e   : > { %v486_v16 = vpop.permute.xlu1 %485 }
 0x13f   : > { %v417_v17 = vpop.permute.xlu0 %416  ;;  %v491_v18 = vsel %vm347_vm2, %v486_v16, 0 }
 0x140   : > { %859 = vmatmul.msk.bf16.vlgmr.msra.gmra.mxu1 %vm347_vm2, %v341_v5  ;;  %v422_v19 = vsel %vm347_vm2, %v417_v17, 0  ;;  %500 = vmatpush.bf16.xpose.msrb.mxu0 %v491_v18 }
 0x141   : > { %431 = vmatpush.bf16.xpose.msra.mxu3 %v422_v19 }
 0x147   : > { %863 = vmatmul.msk.bf16.vlgmr.msrb.gmra.mxu0 %vm347_vm2, %v484_v9  ;;  %v553_v21 = vpop.permute.xlu0 %552 }
 0x148   : > { %861 = vmatmul.msk.bf16.vlgmr.msra.gmra.mxu3 %vm347_vm2, %v415_v13 }
 0x149   : > { %569 = vmatpush.bf16.xpose.msrb.mxu3 %v560_v20 }
 0x158   : > { %865 = vmatmul.msk.bf16.vlgmr.msrb.gmra.mxu3 %vm347_vm2, %v553_v21 }
 0x1bd   : > { %v363_v23 = vpop.f32.mrf.mxu1 }
 0x1be   : > { %v364_v24 = vadd.f32 %v363_v23, %v340_v22 }
 0x1c0   : > { %v367_v25 = vsel %vm347_vm2, %v364_v24, -inf }
 0x1c1   : > { %368 = vmax.xlane.f32.xlu1 %v367_v25 }
 0x1c4   : > { %v502_v26 = vpop.f32.mrf.mxu0 }
 0x1c5   : > { %v365_v27 = vpop.f32.mrf.mxu1  ;;  %v503_v28 = vadd.f32 %v502_v26, %v340_v22 }
 0x1c7   : > { %v506_v29 = vsel %vm347_vm2, %v503_v28, -inf }
 0x1c8   : > { %507 = vmax.xlane.f32.xlu2 %v506_v29 }
 0x1cb   : > { %v433_v30 = vpop.f32.mrf.mxu3 }
 0x1cc   : > { %v434_v31 = vadd.f32 %v433_v30, %v340_v22  ;;  %v504_v32 = vpop.f32.mrf.mxu0 }
 0x1ce   : > { %v437_v33 = vsel %vm347_vm2, %v434_v31, -inf }
 0x1cf   : > { %438 = vmax.xlane.f32.xlu0 %v437_v33 }
 0x1d3   : > { %v435_v34 = vpop.f32.mrf.mxu3 }
 0x1da   : > { %447 = vrot.lane.b32.xlu1 %v1429_v7, %s1251_s14  ;;  %s1177_s14 = scalar_lea.hbm %s1176_s13, 8 }
 0x1db   : > { %v571_v35 = vpop.f32.mrf.mxu3  ;;  %p1178_p1 = scmp.ne.s32.totalorder %s1176_s13, %s1177_s14  ;;  %p1183_p7 = scmp.lt.s32.totalorder %s1181_s17, %s1177_s14 }
 0x1dc   : > { %v572_v36 = vadd.f32 %v571_v35, %v340_v22 }
 0x1dd   : > { %p1179_p3 = pnand %p1178_p1, %p1375_p4  ;;  %p1184_p8 = por %p1183_p7, %p1182_p12 }
 0x1de   : > { %v575_v37 = vsel %vm347_vm2, %v572_v36, -inf }
 0x1df   : > { %576 = vmax.xlane.f32.xlu0 %v575_v37  ;;  %p1180_p5 = pneg %p1179_p3 }
 0x1e0   : > { %516 = vrot.lane.b32.xlu2 %v1429_v7, %s1252_s15 }
 0x1e1   : > { %p1185_p9 = pnand %p1184_p8, %p1180_p5 }
 0x1e3   : > { %v573_v38 = vpop.f32.mrf.mxu3 }
 0x1f3   : > { %585 = vrot.lane.b32.xlu0 %v1429_v7, %s1253_s16 }
 0x234   : > { %v369_v39 = vpop.xlane.xlu1 %368 }
 0x235   : > { %v370_v40 = vsub.f32 %v364_v24, %v369_v39 }
 0x237   : > { %v371_v41 = vmul.f32 1.442695, %v370_v40 }
 0x239   : > { %991 = vpow2.f32 %v371_v41 }
 0x23b   : > { %v508_v42 = vpop.xlane.xlu2 %507 }
 0x23c   : > { %v509_v43 = vsub.f32 %v503_v28, %v508_v42 }
 0x23e   : > { %v510_v44 = vmul.f32 1.442695, %v509_v43 }
 0x23f   : > { %v992_v45 = vpop.eup %991 }
 0x240   : > { %993 = vpow2.f32 %v510_v44  ;;  %v373_v46 = vsel %vm347_vm2, %v992_v45, 0.0  ;;  %v376_v47 = vpack.c.bf16 %v992_v45, %v992_v45 }
 0x241   : > { %374 = vadd.xlane.f32.xlu0 %v373_v46 }
 0x242   : > { %860 = vmatmul.msk.bf16.vlgmr.msra.gmra.mxu2 %vm347_vm2, %v376_v47  ;;  %v439_v48 = vpop.xlane.xlu0 %438 }
 0x243   : > { %v440_v49 = vsub.f32 %v434_v31, %v439_v48  ;;  %v517_v50 = vpop.permute.xlu2 %516 }
 0x244   : > { %v522_v51 = vsel %vm382_vm1, %v517_v50, 0  ;;  %v883_v50 = vld [vmem:[#allocation7 + $0x8] sm:$0xff] }
 0x245   : > { %v441_v52 = vmul.f32 1.442695, %v440_v49  ;;  %531 = vmatpush.bf16.msrb.mxu1 %v522_v51  ;;  %668 = vmatpush.bf16.msra.mxu0 %v883_v50 }
 0x246   : > { %v994_v53 = vpop.eup %993 }
 0x247   : > { %995 = vpow2.f32 %v441_v52  ;;  %v512_v54 = vsel %vm347_vm2, %v994_v53, 0.0  ;;  %v515_v55 = vpack.c.bf16 %v994_v53, %v994_v53  ;;  %v882_v52 = vld [vmem:[#allocation7] sm:$0xff] }
 0x248   : > { %513 = vadd.xlane.f32.xlu1 %v512_v54 }
 0x249   : > { %864 = vmatmul.msk.bf16.vlgmr.msrb.gmra.mxu1 %vm347_vm2, %v515_v55  ;;  %669 = vmatpush.bf16.msra.mxu0 %v882_v52 }
 0x24c   : > { %v448_v56 = vpop.permute.xlu1 %447 }
 0x24d   : > { %v996_v57 = vpop.eup %995  ;;  %v453_v58 = vsel %vm382_vm1, %v448_v56, 0 }
 0x24e   : > { %462 = vmatpush.bf16.msrb.mxu2 %v453_v58  ;;  %v443_v59 = vsel %vm347_vm2, %v996_v57, 0.0  ;;  %v446_v60 = vpack.c.bf16 %v996_v57, %v996_v57 }
 0x24f   : > { %444 = vadd.xlane.f32.xlu2 %v443_v59 }
 0x252   : > { %862 = vmatmul.msk.bf16.vlgmr.msrb.gmra.mxu2 %vm347_vm2, %v446_v60  ;;  %v577_v61 = vpop.xlane.xlu0 %576 }
 0x253   : > { %v578_v62 = vsub.f32 %v572_v36, %v577_v61 }
 0x255   : > { %v579_v63 = vmul.f32 1.442695, %v578_v62 }
 0x257   : > { %997 = vpow2.f32 %v579_v63 }
 0x25d   : > { %v998_v0 = vpop.eup %997 }
 0x25e   : > { %v581_v1 = vsel %vm347_vm2, %v998_v0, 0.0  ;;  %v584_v5 = vpack.c.bf16 %v998_v0, %v998_v0 }
 0x25f   : > { %582 = vadd.xlane.f32.xlu1 %v581_v1 }
 0x265   : > { %v586_v3 = vpop.permute.xlu0 %585 }
 0x266   : > { %v591_v4 = vsel %vm382_vm1, %v586_v3, 0 }
 0x267   : > { %600 = vmatpush.bf16.msra.mxu2 %v591_v4 }
 0x26a   : > { %866 = vmatmul.msk.bf16.vlgmr.msra.gmra.mxu2 %vm347_vm2, %v584_v5 }
 0x2b4   : > { %v375_v6 = vpop.xlane.xlu0 %374 }
 0x2b5   : > { %999 = vrcp.f32 %v375_v6  ;;  %v410_v11 = vand.u32 2147483648, %v375_v6  ;;  %v408_v13 = vand.u32 2147483647, %v375_v6  ;;  %vm404_vm4 = vweird.f32 %v375_v6 }
 0x2b7   : > { %v411_v18 = vor.u32 1.1754944e-38, %v410_v11  ;;  %vm409_vm6 = vcmp.eq.f32.partialorder %v408_v13, 8.507059e+37 }
 0x2bb   : > { %v1000_v7 = vpop.eup %999  ;;  %v514_v8 = vpop.xlane.xlu1 %513 }
 0x2bc   : > { %v400_v9 = vmul.f32 %v1000_v7, %v375_v6  ;;  %1001 = vrcp.f32 %v514_v8  ;;  %vm405_vm3 = vweird.f32 %v1000_v7  ;;  %v548_v25 = vand.u32 2147483648, %v514_v8 }
 0x2bd   : > { %vm406_vm5 = vmor %vm404_vm4, %vm405_vm3  ;;  %v546_v27 = vand.u32 2147483647, %v514_v8  ;;  %vm542_vm8 = vweird.f32 %v514_v8 }
 0x2be   : > { %v401_v10 = vsub.f32 1.0, %v400_v9  ;;  %v549_v31 = vor.u32 1.1754944e-38, %v548_v25 }
 0x2bf   : > { %vm547_vm10 = vcmp.eq.f32.partialorder %v546_v27, 8.507059e+37 }
 0x2c0   : > { %v402_v12 = vmul.f32 %v1000_v7, %v401_v10 }
 0x2c2   : > { %v1002_v14 = vpop.eup %1001  ;;  %v445_v15 = vpop.xlane.xlu2 %444  ;;  %v403_v16 = vadd.f32 %v1000_v7, %v402_v12 }
 0x2c3   : > { %v538_v17 = vmul.f32 %v1002_v14, %v514_v8  ;;  %1003 = vrcp.f32 %v445_v15  ;;  %vm543_vm7 = vweird.f32 %v1002_v14  ;;  %v479_v39 = vand.u32 2147483648, %v445_v15  ;;  %v988_v8 = vld [vmem:[#allocation10] ss:$0 sm:$0xff] }
 0x2c4   : > { %v407_v19 = vsel %vm406_vm5, %v1000_v7, %v403_v16  ;;  %vm544_vm9 = vmor %vm542_vm8, %vm543_vm7  ;;  %vm473_vm12 = vweird.f32 %v445_v15  ;;  %v477_v41 = vand.u32 2147483647, %v445_v15  ;;  %vm634_vm5 = vcmask 130048  }
 0x2c5   : > { %v539_v20 = vsub.f32 1.0, %v538_v17  ;;  %v395_v21 = vpop.f32.mrf.mxu2  ;;  %v412_v22 = vsel %vm409_vm6, %v411_v18, %v407_v19  ;;  %v480_v43 = vor.u32 1.1754944e-38, %v479_v39  ;;  %vm636_vm6 = vcmask 195584  }
 0x2c6   : > { %v413_v23 = vmul.f32 %v412_v22, %v395_v21  ;;  %v533_v24 = vpop.f32.mrf.mxu1  ;;  %vm478_vm14 = vcmp.eq.f32.partialorder %v477_v41, 8.507059e+37 }
 0x2c7   : > { %v540_v26 = vmul.f32 %v1002_v14, %v539_v20 }
 0x2c8   : > { %630 = vrot.lane.b32.xlu0 %v413_v23, %s1254_s9 }
 0x2c9   : > { %v1004_v28 = vpop.eup %1003  ;;  %v541_v29 = vadd.f32 %v1002_v14, %v540_v26 }
 0x2ca   : > { %v469_v30 = vmul.f32 %v1004_v28, %v445_v15  ;;  %vm474_vm11 = vweird.f32 %v1004_v28 }
 0x2cb   : > { %v545_v32 = vsel %vm544_vm9, %v1002_v14, %v541_v29  ;;  %vm475_vm13 = vmor %vm473_vm12, %vm474_vm11  ;;  %v1257_v14 = vmov 32.0  }
 0x2cc   : > { %v470_v33 = vsub.f32 1.0, %v469_v30  ;;  %v550_v34 = vsel %vm547_vm10, %v549_v31, %v545_v32 }
 0x2cd   : > { %v551_v35 = vmul.f32 %v550_v34, %v533_v24  ;;  %v397_v36 = vpop.f32.mrf.mxu2  ;;  %v989_v34 = vld [vmem:[#allocation10 + $0x1] ss:$0 sm:$0xff] }
 0x2ce   : > { %v535_v37 = vpop.f32.mrf.mxu1  ;;  %v471_v38 = vmul.f32 %v1004_v28, %v470_v33 }
 0x2cf   : > { %622 = vrot.lane.b32.xlu2 %v551_v35, %s1255_s22  ;;  %v990_v37 = vld [vmem:[#allocation10 + $0x2] ss:$0 sm:$0xff] }
 0x2d0   : > { %v472_v40 = vadd.f32 %v1004_v28, %v471_v38 }
 0x2d2   : > { %v476_v42 = vsel %vm475_vm13, %v1004_v28, %v472_v40  ;;  %v583_v51 = vpop.xlane.xlu1 %582 }
 0x2d3   : > { %v481_v45 = vsel %vm478_vm14, %v480_v43, %v476_v42  ;;  %1005 = vrcp.f32 %v583_v51  ;;  %v617_v58 = vand.u32 2147483648, %v583_v51  ;;  %vm611_vm1 = vweird.f32 %v583_v51 }
 0x2d4   : > { %v615_v59 = vand.u32 2147483647, %v583_v51  ;;  %1007 = vrcp.f32 %v1257_v14 }
 0x2d5   : > { %v464_v44 = vpop.f32.mrf.mxu2  ;;  %v618_v61 = vor.u32 1.1754944e-38, %v617_v58 }
 0x2d6   : > { %v482_v46 = vmul.f32 %v481_v45, %v464_v44  ;;  %vm616_vm4 = vcmp.eq.f32.partialorder %v615_v59, 8.507059e+37 }
 0x2d8   : > { %626 = vrot.lane.b32.xlu1 %v482_v46, %s1256_s30 }
 0x2d9   : > { %v1006_v53 = vpop.eup %1005 }
 0x2da   : > { %v607_v54 = vmul.f32 %v1006_v53, %v583_v51  ;;  %vm612_vm15 = vweird.f32 %v1006_v53  ;;  %v1008_v15 = vpop.eup %1007 }
 0x2db   : > { %vm613_vm3 = vmor %vm611_vm1, %vm612_vm15  ;;  %v680_v16 = vmul.f32 32.0, %v1008_v15 }
 0x2dc   : > { %v608_v55 = vsub.f32 1.0, %v607_v54 }
 0x2dd   : > { %v466_v47 = vpop.f32.mrf.mxu2  ;;  %v681_v17 = vsub.f32 1.0, %v680_v16 }
 0x2de   : > { %v609_v56 = vmul.f32 %v1006_v53, %v608_v55 }
 0x2df   : > { %v682_v18 = vmul.f32 %v1008_v15, %v681_v17 }
 0x2e0   : > { %v610_v57 = vadd.f32 %v1006_v53, %v609_v56 }
 0x2e1   : > { %v683_v19 = vadd.f32 %v1008_v15, %v682_v18 }
 0x2e2   : > { %v614_v60 = vsel %vm613_vm3, %v1006_v53, %v610_v57 }
 0x2e3   : > { %v619_v62 = vsel %vm616_vm4, %v618_v61, %v614_v60 }
 0x2ed   : > { %v602_v48 = vpop.f32.mrf.mxu2 }
 0x2ee   : > { %v620_v0 = vmul.f32 %v619_v62, %v602_v48 }
 0x2f5   : > { %v604_v49 = vpop.f32.mrf.mxu2 }
 0x329   : > { %v623_v63 = vpop.permute.xlu2 %622 }
 0x32a   : > { %v633_v1 = vsel %vm347_vm2, %v620_v0, %v623_v63  ;;  %vm684_vm2 = vweird.f32 %v1008_v15 }
 0x32b   : > { %v685_v20 = vsel %vm684_vm2, %v1008_v15, %v683_v19 }
 0x33a   : > { %v631_v4 = vpop.permute.xlu0 %630 }
 0x34a   : > { %v627_v3 = vpop.permute.xlu1 %626 }
 0x34b   : > { %v635_v5 = vsel %vm634_vm5, %v633_v1, %v627_v3 }
 0x34c   : > { %v637_v6 = vsel %vm636_vm6, %v635_v5, %v631_v4 }
 0x34d   : > { %v638_v7 = vpack.c.bf16 %v637_v6, %v637_v6 }
 0x34f   : > { %875 = vmatmul.msk.bf16.vlgmr.msra.gmra.mxu0 %vm323_vm0, %v638_v7 }
 0x3cc   : > { %v671_v9 = vpop.f32.mrf.mxu0 }
 0x3cd   : > { %v672_v10 = vadd.f32 %v988_v8, %v671_v9 }
 0x3cf   : > { %v675_v11 = vadd.f32 %v672_v10, %v1424_v2 }
 0x3d1   : > { %v676_v12 = vsel %vm323_vm0, %v675_v11, 0.0 }
 0x3d2   : > { %677 = vadd.xlane.f32.xlu2 %v676_v12 }
 0x3d4   : > { %v673_v13 = vpop.f32.mrf.mxu0 }
 0x445   : > { %v678_v21 = vpop.xlane.xlu2 %677 }
 0x446   : > { %v686_v22 = vmul.f32 %v685_v20, %v678_v21 }
 0x448   : > { %v687_v23 = vsub.f32 %v675_v11, %v686_v22 }
 0x44a   : > { %v688_v24 = vmul.f32 %v687_v23, %v687_v23 }
 0x44c   : > { %v689_v2 = vsel %vm323_vm0, %v688_v24, 0.0 }
 0x44d   : > { %690 = vadd.xlane.f32.xlu0 %v689_v2 }
 0x4c0   : > { %v691_v25 = vpop.xlane.xlu0 %690 }
 0x4c1   : > { %v692_v26 = vmul.f32 %v691_v25, %v685_v20 }
 0x4c3   : > { %v693_v27 = vadd.f32 1e-05, %v692_v26 }
 0x4c5   : > { %1009 = vrsqrt.f32 %v693_v27  ;;  %vm700_vm8 = vweird.f32 %v693_v27 }
 0x4cb   : > { %v1010_v28 = vpop.eup %1009 }
 0x4cc   : > { %v695_v29 = vmul.f32 %v1010_v28, %v693_v27  ;;  %vm701_vm7 = vweird.f32 %v1010_v28 }
 0x4cd   : > { %vm702_vm9 = vmor %vm700_vm8, %vm701_vm7 }
 0x4ce   : > { %v696_v30 = vmul.f32 %v1010_v28, %v695_v29 }
 0x4d0   : > { %v697_v31 = vmul.f32 0.5, %v696_v30 }
 0x4d2   : > { %v698_v32 = vsub.f32 1.5, %v697_v31 }
 0x4d4   : > { %v699_v33 = vmul.f32 %v1010_v28, %v698_v32 }
 0x4d6   : > { %v703_v35 = vsel %vm702_vm9, %v1010_v28, %v699_v33 }
 0x4d7   : > { %v704_v36 = vmul.f32 %v703_v35, %v687_v23 }
 0x4d9   : > { %v706_v38 = vmul.f32 %v989_v34, %v704_v36 }
 0x4db   : > { %v708_v39 = vadd.f32 %v990_v37, %v706_v38 }
 0x4dd   : > { %709 = vst.msk [vmem:[%s303_s27] sm:$0xff] %vm323_vm0, %v708_v39 }
 0x4de   : > { %1188 = shalt.err (!%p1185_p9)
}
 0x4df   : > { %902 = dma.vmem_to_hbm [thread:$0]  (%p1375_p4), %s724_s28, 128, %s726_s6, %s711_s25  }
 0x4e0 PF: > { %s737_s10 = sand.u32 1, %s1223_s18   ;;  %p1520_p10 = scmp.ge.s32.totalorder %s1235_s21, 2 }
 0x4e1   : > { %s738_s30 = scalar_lea.sflag [#allocation4], %s737_s10 }
 0x4e2   : > { %p922_p13 = pnand %p1520_p10, %p1379_p6 }
 0x4e4   : > { %p923_p11 = pneg %p922_p13 }
 0x4e6   : > { %1218 = dma.done.wait (%p923_p11), %s738_s30, 128  }
 0x4e7   : > { %1220 = vsyncadd (%p923_p11), %s738_s30, 4294967168  ;;  %p20_p0 = scmp.ge.s32.totalorder %s1349_s29, 4   ;;  %s1521_s18 = smov %s1227_s19 }
 0x4e8   : > { %s1522_s19 = smov %s1231_s20  ;;  %s1523_s20 = smov %s1360_s8 }
 0x4e9   : > { %s1524_s21 = smov %s1349_s29  ;;  %22 = sbr.rel (!%p20_p0) target bundleno = 7 (0x7), region = 101 }
 0x4ee   :  { %744 = vsyncpa [#allocation3], 1 }
 0x4ef   :  { %746 = vsyncpa [#allocation3 + $0x1], 1 }
 0x4f0   :  { %747 = vsyncpa [#allocation6], 1 }
 0x4f1   :  { %748 = vsyncpa [#allocation9], 1 }
 0x4f2   :  { %749 = vsyncpa [#allocation4], 1 }
 0x4f3   :  { %751 = vsyncpa [#allocation4 + $0x1], 1 }

// kernel: tpu_custom_call.1
= control target key start
LH: loop header
LB: loop body
LE: loop exit
PB: predicated region body
PF: predicated region fallthrough
CT: control target
= control target key end

     0   :  { %10 = vsyncpa [#allocation3], 0  ;;  %s1507_s0 = inlined_call_operand.hbm [shape: f32[2,8,32], index: 0, kind: input, shape index: {}]   ;;  %s1508_s1 = inlined_call_operand.hbm [shape: bf16[32,96], index: 1, kind: input, shape index: {}]   ;;  %s1509_s2 = inlined_call_operand.hbm [shape: bf16[32,32], index: 2, kind: input, shape index: {}]   ;;  %s1510_s3 = inlined_call_operand.hbm [shape: f32[8,8], index: 3, kind: input, shape index: {}]   ;;  %s1511_s4 = inlined_call_operand.hbm [shape: f32[3,32], index: 4, kind: input, shape index: {}]   ;;  %s1512_s5 = inlined_call_operand.hbm [shape: f32[2,8,32], index: 5, kind: output, shape index: {}]  }
   0x1   :  { %12 = vsyncpa [#allocation3 + $0x1], 0 }
   0x2   :  { %13 = vsyncpa [#allocation6], 0 }
   0x3   :  { %14 = vsyncpa [#allocation9], 0 }
   0x4   :  { %15 = vsyncpa [#allocation4], 0 }
   0x5   :  { %17 = vsyncpa [#allocation4 + $0x1], 0  ;;  %s1288_s18 = smov 0   ;;  %s1290_s19 = smov 0  }
   0x6   :  { %s1292_s20 = smov 0   ;;  %s1294_s21 = smov 0  }
   0x7 LB: > { %s175_s24 = sshll.u32 %s1508_s1, 4  ;;  %s1312_s25 = sadd.s32 4294967295, %s1235_s21   ;;  %s1235_s21 = sphi %s1294_s21, %s1524_s21   ;;  %s1231_s20 = sphi %s1292_s20, %s1523_s20   ;;  %s1227_s19 = sphi %s1290_s19, %s1522_s19   ;;  %s1223_s18 = sphi %s1288_s18, %s1521_s18   ;;  %s176_s24 = int_to_ptr.hbm [resolvable:$true] %s175_s24 }
   0x8   : > { %p835_p0 = scmp.ge.s32.totalorder %s1235_s21, 1  ;;  %p44_p1 = scmp.eq.s32.totalorder %s1312_s25, 0 }
   0x9   : > { %p164_p2 = scmp.lt.s32.totalorder %s1235_s21, 3  ;;  %s1237_s27 = smov [#allocation5]  }
   0xa   : > { %s177_s28 = sshll.u32 %s1237_s27, 4  ;;  %s204_s6 = sshll.u32 %s1510_s3, 4  ;;  %s178_s28 = int_to_ptr.vmem [resolvable:$true] %s177_s28  ;;  %s205_s6 = int_to_ptr.hbm [resolvable:$true] %s204_s6 }
   0xb   : > { %p1317_p3 = pnand %p835_p0, %p164_p2  ;;  %s189_s10 = sshll.u32 %s1509_s2, 4  ;;  %s190_s10 = int_to_ptr.hbm [resolvable:$true] %s189_s10 }
   0xc   : > { %s1238_s11 = smov [#allocation8]   ;;  %s1239_s13 = smov 64  }
   0xd   : > { %p904_p4 = pneg %p1317_p3  ;;  %s206_s12 = sshll.u32 %s1238_s11, 4  ;;  %s207_s12 = int_to_ptr.vmem [resolvable:$true] %s206_s12 }
   0xe   : > { %s1240_s14 = smov 4   ;;  %s216_s17 = sshll.u32 %s1511_s4, 4  ;;  %s217_s17 = int_to_ptr.hbm [resolvable:$true] %s216_s17 }
   0xf   : > { %p1329_p6 = pnand %p904_p4, %p44_p1  ;;  %s1241_s22 = smov [#allocation7]  }
  0x10   : > { %s191_s23 = sshll.u32 %s1241_s22, 4  ;;  %s1349_s29 = sadd.s32 1, %s1235_s21   ;;  %s192_s23 = int_to_ptr.vmem [resolvable:$true] %s191_s23 }
  0x11   : > { %907 = dma.hbm_to_vmem [thread:$0]  (!%p1329_p6), %s176_s24, 256, %s178_s28, [#allocation6], %s1239_s13, %s1239_s13, %s1240_s14  }
  0x12   : > { %913 = dma.hbm_to_vmem [thread:$0]  (!%p1329_p6), %s205_s6, 128, %s207_s12, [#allocation9]  }
  0x13   : > { %910 = dma.hbm_to_vmem [thread:$0]  (!%p1329_p6), %s190_s10, 256, %s192_s23, [#allocation6], %s1239_s13, %s1239_s13, %s1240_s14  }
  0x14   : > { %s1242_s24 = smov [#allocation10]   ;;  %s834_s28 = sadd.s32 4294967294, %s1235_s21  }
  0x15   : > { %s218_s27 = sshll.u32 %s1242_s24, 4  ;;  %s27_s30 = ssub.s32 %s1235_s21, %s1349_s29  ;;  %s219_s27 = int_to_ptr.vmem [resolvable:$true] %s218_s27 }
  0x16   : > { %916 = dma.hbm_to_vmem [thread:$0]  (!%p1329_p6), %s217_s17, 64, %s219_s27, [#allocation9]  }
  0x17   : > { %s30_s6 = sadd.s32 1, %s1231_s20  ;;  %p28_p7 = scmp.eq.s32.totalorder %s27_s30, 0 }
  0x18   : > { %p37_p8 = scmp.ne.s32.totalorder %s1231_s20, %s1227_s19  ;;  %p38_p9 = scmp.eq.s32.totalorder %s1235_s21, 0 }
  0x19   : > { %p43_p10 = scmp.ne.s32.totalorder %s1227_s19, %s1223_s18  ;;  %p151_p13 = scmp.eq.s32.totalorder %s1312_s25, 1 }
  0x1a   : > { %s1360_s8 = scalar_select %p28_p7, %s1231_s20, %s30_s6  }
  0x1b   : > { %p1362_p11 = por %p38_p9, %p37_p8  ;;  %p1368_p12 = por %p44_p1, %p43_p10 }
  0x1c   : > { %p157_p0 = scmp.eq.s32.totalorder %s834_s28, 1  ;;  %p929_p2 = scmp.lt.s32.totalorder %s1235_s21, 2 }
  0x1d   : > { %s229_s10 = sand.u32 1, %s1231_s20   ;;  %p1375_p4 = por %p151_p13, %p37_p8 }
  0x1e   : > { %p1379_p6 = por %p157_p0, %p43_p10  ;;  %s841_s13 = sshll.u32 %s229_s10, 3 }
  0x1f   : > { %s842_s14 = sshll.u32 %s1235_s21, 3  ;;  %s233_s22 = scalar_lea.vmem [#allocation2], %s841_s13 }
  0x20   : > { %s237_s17 = scalar_lea.hbm %s1507_s0, %s842_s14  ;;  %s241_s23 = sshll.u32 %s233_s22, 4  ;;  %s242_s23 = int_to_ptr.vmem [resolvable:$true] %s241_s23 }
  0x21   : > { %s239_s24 = sshll.u32 %s237_s17, 4  ;;  %p1389_p7 = pnand %p929_p2, %p1362_p11  ;;  %s240_s24 = int_to_ptr.hbm [resolvable:$true] %s239_s24 }
  0x22   : > { %s230_s28 = scalar_lea.sflag [#allocation3], %s229_s10  ;;  %s1131_s30 = sshra.s32 %s240_s24, 4  ;;  %s1132_s30 = int_to_ptr.hbm [resolvable:$true] %s1131_s30 }
  0x23   : > { %s1133_s6 = scalar_lea.hbm %s1132_s30, 8  ;;  %p1135_p9 = pneg %p1389_p7 }
  0x24   : > { %p1134_p8 = scmp.ne.s32.totalorder %s1132_s30, %s1133_s6  ;;  %s1138_s15 = scalar_lea.hbm %s1507_s0, 16 }
  0x25   : > { %p1139_p11 = scmp.lt.s32.totalorder %s1132_s30, %s1507_s0  ;;  %p1140_p0 = scmp.lt.s32.totalorder %s1138_s15, %s1133_s6 }
  0x26   : > { %p1136_p10 = pnand %p1135_p9, %p1134_p8 }
  0x27   : > { %p1141_p2 = por %p1140_p0, %p1139_p11 }
  0x28   : > { %p1137_p13 = pneg %p1136_p10 }
  0x2a   : > { %p1142_p5 = pnand %p1141_p2, %p1137_p13 }
  0x2c   : > { %1145 = shalt.err (!%p1142_p5)
}
  0x2d   : > { %920 = dma.hbm_to_vmem [thread:$0]  (!%p1389_p7), %s240_s24, 128, %s242_s23, %s230_s28  }
  0x2e   : > { %250 = sbr.rel (%p1317_p3) target bundleno = 1248 (0x4e0), region = 40  ;;  %s1406_s10 = sand.u32 (!%p1317_p3), 1, %s1227_s19  }
  0x2f   : > { %s844_s17 = sshll.u32 (!%p1317_p3), %s1406_s10, 3  ;;  %s253_s22 = scalar_lea.sflag (!%p1317_p3), [#allocation3], %s1406_s10 }
  0x30   : > { %s256_s30 = scalar_lea.vmem (!%p1317_p3), [#allocation2], %s844_s17 }
  0x33   : > { %1206 = dma.done.wait (%p1368_p12), %s253_s22, 128  }
  0x34   : > { %1208 = vsyncadd (%p1368_p12), %s253_s22, 4294967168 }
  0x35   : > { %1210 = dma.done.wait (%p44_p1), [#allocation6], 512  }
  0x36   : > { %1212 = vsyncadd (%p44_p1), [#allocation6], 4294966784 }
  0x37   : > { %1214 = dma.done.wait (%p44_p1), [#allocation9], 192  }
  0x38   : > { %1216 = vsyncadd (%p44_p1), [#allocation9], 4294967104  ;;  %v881_v0 = vld [vmem:[#allocation5 + $0x8] sm:$0xff]  ;;  %v880_v1 = vld [vmem:[#allocation5] sm:$0xff]  ;;  %vm323_vm0 = vcmask 261120   ;;  %s1243_s26 = smov 112  }
  0x39   : > { %333 = vmatpush.bf16.msra.mxu0 %v881_v0  ;;  %v1424_v2 = vld [vmem:[%s256_s30] sm:$0xff]  ;;  %s1244_s7 = smov 120   ;;  %s1245_s23 = smov 96   ;;  %vm382_vm1 = vcmask 1043456   ;;  %vm347_vm2 = vcmask 64512   ;;  %v340_v22 = vld [vmem:[#allocation8] sm:$0xff] }
  0x3a   : > { %v306_v3 = vpack.c.bf16 %v1424_v2, %v1424_v2  ;;  %s1246_s24 = smov 72   ;;  %s1247_s27 = smov 80  }
  0x3b   : > { %s1248_s28 = smov 88   ;;  %s1249_s6 = smov 64  }
  0x3c   : > { %s1250_s13 = smov 104   ;;  %s1251_s14 = smov 56  }
  0x3d   : > { %334 = vmatpush.bf16.msra.mxu0 %v880_v1  ;;  %s1252_s15 = smov 48   ;;  %s1253_s16 = smov 40  }
  0x3e   : > { %s1254_s9 = smov 24   ;;  %s1255_s22 = smov 8  }
  0x3f   : > { %s1256_s30 = smov 16  }
  0x40   : > { %858 = vmatmul.msk.bf16.vlgmr.msra.gmra.mxu0 %vm323_vm0, %v306_v3 }
  0xbd   : > { %v336_v4 = vpop.f32.mrf.mxu0 }
  0xbe   : > { %v341_v5 = vpack.c.bf16 %v336_v4, %v336_v4 }
  0xc0   : > { %v343_v6 = vunpack.c.l.b16 %v341_v5 }
  0xc2   : > { %v1429_v7 = vpack.c.b16 %v343_v6, %v343_v6 }
  0xc4   : > { %483 = vrot.lane.b32.xlu2 %v1429_v7, %s1243_s26  ;;  %414 = vrot.lane.b32.xlu1 %v1429_v7, %s1244_s7  ;;  %s877_s26 = sshll.u32 %s1312_s25, 3  ;;  %s711_s25 = scalar_lea.sflag [#allocation4], %s1406_s10 }
  0xc5   : > { %345 = vrot.lane.b32.xlu0 %v1429_v7, %s1245_s23  ;;  %v338_v8 = vpop.f32.mrf.mxu0 }
  0xcc   : > { %554 = vrot.lane.b32.xlu2 %v1429_v7, %s1246_s24  ;;  %485 = vrot.lane.b32.xlu1 %v1429_v7, %s1247_s27  ;;  %s721_s24 = scalar_lea.hbm %s1512_s5, %s877_s26  ;;  %s303_s27 = scalar_lea.vmem [#allocation11], %s844_s17 }
  0xcd   : > { %416 = vrot.lane.b32.xlu0 %v1429_v7, %s1248_s28  ;;  %s723_s28 = sshll.u32 %s303_s27, 4  ;;  %s1181_s17 = scalar_lea.hbm %s1512_s5, 16  ;;  %s724_s28 = int_to_ptr.vmem [resolvable:$true] %s723_s28 }
  0xd4   : > { %377 = vrot.lane.b32.xlu2 %v1429_v7, %s1249_s6  ;;  %s725_s6 = sshll.u32 %s721_s24, 4  ;;  %s726_s6 = int_to_ptr.hbm [resolvable:$true] %s725_s6 }
  0xd5   : > { %552 = vrot.lane.b32.xlu0 %v1429_v7, %s1250_s13  ;;  %s1175_s13 = sshra.s32 %s726_s6, 4  ;;  %s1176_s13 = int_to_ptr.hbm [resolvable:$true] %s1175_s13 }
  0xd6   : > { %p1182_p12 = scmp.lt.s32.totalorder %s1176_s13, %s1512_s5 }
 0x11e   : > { %v484_v9 = vpop.permute.xlu2 %483 }
 0x126   : > { %v555_v10 = vpop.permute.xlu2 %554 }
 0x127   : > { %v560_v20 = vsel %vm347_vm2, %v555_v10, 0 }
 0x12e   : > { %v378_v11 = vpop.permute.xlu2 %377 }
 0x12f   : > { %v384_v12 = vsel %vm382_vm1, %v378_v11, 0 }
 0x130   : > { %393 = vmatpush.bf16.msra.mxu2 %v384_v12 }
 0x136   : > { %v415_v13 = vpop.permute.xlu1 %414 }
 0x137   : > { %v346_v14 = vpop.permute.xlu0 %345 }
 0x138   : > { %v352_v15 = vsel %vm347_vm2, %v346_v14, 0 }
 0x139   : > { %361 = vmatpush.bf16.xpose.msra.mxu1 %v352_v15 }
 0x13e   : > { %v486_v16 = vpop.permute.xlu1 %485 }
 0x13f   : > { %v417_v17 = vpop.permute.xlu0 %416  ;;  %v491_v18 = vsel %vm347_vm2, %v486_v16, 0 }
 0x140   : > { %859 = vmatmul.msk.bf16.vlgmr.msra.gmra.mxu1 %vm347_vm2, %v341_v5  ;;  %v422_v19 = vsel %vm347_vm2, %v417_v17, 0  ;;  %500 = vmatpush.bf16.xpose.msrb.mxu0 %v491_v18 }
 0x141   : > { %431 = vmatpush.bf16.xpose.msra.mxu3 %v422_v19 }
 0x147   : > { %863 = vmatmul.msk.bf16.vlgmr.msrb.gmra.mxu0 %vm347_vm2, %v484_v9  ;;  %v553_v21 = vpop.permute.xlu0 %552 }
 0x148   : > { %861 = vmatmul.msk.bf16.vlgmr.msra.gmra.mxu3 %vm347_vm2, %v415_v13 }
 0x149   : > { %569 = vmatpush.bf16.xpose.msrb.mxu3 %v560_v20 }
 0x158   : > { %865 = vmatmul.msk.bf16.vlgmr.msrb.gmra.mxu3 %vm347_vm2, %v553_v21 }
 0x1bd   : > { %v363_v23 = vpop.f32.mrf.mxu1 }
 0x1be   : > { %v364_v24 = vadd.f32 %v363_v23, %v340_v22 }
 0x1c0   : > { %v367_v25 = vsel %vm347_vm2, %v364_v24, -inf }
 0x1c1   : > { %368 = vmax.xlane.f32.xlu1 %v367_v25 }
 0x1c4   : > { %v502_v26 = vpop.f32.mrf.mxu0 }
 0x1c5   : > { %v365_v27 = vpop.f32.mrf.mxu1  ;;  %v503_v28 = vadd.f32 %v502_v26, %v340_v22 }
 0x1c7   : > { %v506_v29 = vsel %vm347_vm2, %v503_v28, -inf }
 0x1c8   : > { %507 = vmax.xlane.f32.xlu2 %v506_v29 }
 0x1cb   : > { %v433_v30 = vpop.f32.mrf.mxu3 }
 0x1cc   : > { %v434_v31 = vadd.f32 %v433_v30, %v340_v22  ;;  %v504_v32 = vpop.f32.mrf.mxu0 }
 0x1ce   : > { %v437_v33 = vsel %vm347_vm2, %v434_v31, -inf }
 0x1cf   : > { %438 = vmax.xlane.f32.xlu0 %v437_v33 }
 0x1d3   : > { %v435_v34 = vpop.f32.mrf.mxu3 }
 0x1da   : > { %447 = vrot.lane.b32.xlu1 %v1429_v7, %s1251_s14  ;;  %s1177_s14 = scalar_lea.hbm %s1176_s13, 8 }
 0x1db   : > { %v571_v35 = vpop.f32.mrf.mxu3  ;;  %p1178_p1 = scmp.ne.s32.totalorder %s1176_s13, %s1177_s14  ;;  %p1183_p7 = scmp.lt.s32.totalorder %s1181_s17, %s1177_s14 }
 0x1dc   : > { %v572_v36 = vadd.f32 %v571_v35, %v340_v22 }
 0x1dd   : > { %p1179_p3 = pnand %p1178_p1, %p1375_p4  ;;  %p1184_p8 = por %p1183_p7, %p1182_p12 }
 0x1de   : > { %v575_v37 = vsel %vm347_vm2, %v572_v36, -inf }
 0x1df   : > { %576 = vmax.xlane.f32.xlu0 %v575_v37  ;;  %p1180_p5 = pneg %p1179_p3 }
 0x1e0   : > { %516 = vrot.lane.b32.xlu2 %v1429_v7, %s1252_s15 }
 0x1e1   : > { %p1185_p9 = pnand %p1184_p8, %p1180_p5 }
 0x1e3   : > { %v573_v38 = vpop.f32.mrf.mxu3 }
 0x1f3   : > { %585 = vrot.lane.b32.xlu0 %v1429_v7, %s1253_s16 }
 0x234   : > { %v369_v39 = vpop.xlane.xlu1 %368 }
 0x235   : > { %v370_v40 = vsub.f32 %v364_v24, %v369_v39 }
 0x237   : > { %v371_v41 = vmul.f32 1.442695, %v370_v40 }
 0x239   : > { %991 = vpow2.f32 %v371_v41 }
 0x23b   : > { %v508_v42 = vpop.xlane.xlu2 %507 }
 0x23c   : > { %v509_v43 = vsub.f32 %v503_v28, %v508_v42 }
 0x23e   : > { %v510_v44 = vmul.f32 1.442695, %v509_v43 }
 0x23f   : > { %v992_v45 = vpop.eup %991 }
 0x240   : > { %993 = vpow2.f32 %v510_v44  ;;  %v373_v46 = vsel %vm347_vm2, %v992_v45, 0.0  ;;  %v376_v47 = vpack.c.bf16 %v992_v45, %v992_v45 }
 0x241   : > { %374 = vadd.xlane.f32.xlu0 %v373_v46 }
 0x242   : > { %860 = vmatmul.msk.bf16.vlgmr.msra.gmra.mxu2 %vm347_vm2, %v376_v47  ;;  %v439_v48 = vpop.xlane.xlu0 %438 }
 0x243   : > { %v440_v49 = vsub.f32 %v434_v31, %v439_v48  ;;  %v517_v50 = vpop.permute.xlu2 %516 }
 0x244   : > { %v522_v51 = vsel %vm382_vm1, %v517_v50, 0  ;;  %v883_v50 = vld [vmem:[#allocation7 + $0x8] sm:$0xff] }
 0x245   : > { %v441_v52 = vmul.f32 1.442695, %v440_v49  ;;  %531 = vmatpush.bf16.msrb.mxu1 %v522_v51  ;;  %668 = vmatpush.bf16.msra.mxu0 %v883_v50 }
 0x246   : > { %v994_v53 = vpop.eup %993 }
 0x247   : > { %995 = vpow2.f32 %v441_v52  ;;  %v512_v54 = vsel %vm347_vm2, %v994_v53, 0.0  ;;  %v515_v55 = vpack.c.bf16 %v994_v53, %v994_v53  ;;  %v882_v52 = vld [vmem:[#allocation7] sm:$0xff] }
 0x248   : > { %513 = vadd.xlane.f32.xlu1 %v512_v54 }
 0x249   : > { %864 = vmatmul.msk.bf16.vlgmr.msrb.gmra.mxu1 %vm347_vm2, %v515_v55  ;;  %669 = vmatpush.bf16.msra.mxu0 %v882_v52 }
 0x24c   : > { %v448_v56 = vpop.permute.xlu1 %447 }
 0x24d   : > { %v996_v57 = vpop.eup %995  ;;  %v453_v58 = vsel %vm382_vm1, %v448_v56, 0 }
 0x24e   : > { %462 = vmatpush.bf16.msrb.mxu2 %v453_v58  ;;  %v443_v59 = vsel %vm347_vm2, %v996_v57, 0.0  ;;  %v446_v60 = vpack.c.bf16 %v996_v57, %v996_v57 }
 0x24f   : > { %444 = vadd.xlane.f32.xlu2 %v443_v59 }
 0x252   : > { %862 = vmatmul.msk.bf16.vlgmr.msrb.gmra.mxu2 %vm347_vm2, %v446_v60  ;;  %v577_v61 = vpop.xlane.xlu0 %576 }
 0x253   : > { %v578_v62 = vsub.f32 %v572_v36, %v577_v61 }
 0x255   : > { %v579_v63 = vmul.f32 1.442695, %v578_v62 }
 0x257   : > { %997 = vpow2.f32 %v579_v63 }
 0x25d   : > { %v998_v0 = vpop.eup %997 }
 0x25e   : > { %v581_v1 = vsel %vm347_vm2, %v998_v0, 0.0  ;;  %v584_v5 = vpack.c.bf16 %v998_v0, %v998_v0 }
 0x25f   : > { %582 = vadd.xlane.f32.xlu1 %v581_v1 }
 0x265   : > { %v586_v3 = vpop.permute.xlu0 %585 }
 0x266   : > { %v591_v4 = vsel %vm382_vm1, %v586_v3, 0 }
 0x267   : > { %600 = vmatpush.bf16.msra.mxu2 %v591_v4 }
 0x26a   : > { %866 = vmatmul.msk.bf16.vlgmr.msra.gmra.mxu2 %vm347_vm2, %v584_v5 }
 0x2b4   : > { %v375_v6 = vpop.xlane.xlu0 %374 }
 0x2b5   : > { %999 = vrcp.f32 %v375_v6  ;;  %v410_v11 = vand.u32 2147483648, %v375_v6  ;;  %v408_v13 = vand.u32 2147483647, %v375_v6  ;;  %vm404_vm4 = vweird.f32 %v375_v6 }
 0x2b7   : > { %v411_v18 = vor.u32 1.1754944e-38, %v410_v11  ;;  %vm409_vm6 = vcmp.eq.f32.partialorder %v408_v13, 8.507059e+37 }
 0x2bb   : > { %v1000_v7 = vpop.eup %999  ;;  %v514_v8 = vpop.xlane.xlu1 %513 }
 0x2bc   : > { %v400_v9 = vmul.f32 %v1000_v7, %v375_v6  ;;  %1001 = vrcp.f32 %v514_v8  ;;  %vm405_vm3 = vweird.f32 %v1000_v7  ;;  %v548_v25 = vand.u32 2147483648, %v514_v8 }
 0x2bd   : > { %vm406_vm5 = vmor %vm404_vm4, %vm405_vm3  ;;  %v546_v27 = vand.u32 2147483647, %v514_v8  ;;  %vm542_vm8 = vweird.f32 %v514_v8 }
 0x2be   : > { %v401_v10 = vsub.f32 1.0, %v400_v9  ;;  %v549_v31 = vor.u32 1.1754944e-38, %v548_v25 }
 0x2bf   : > { %vm547_vm10 = vcmp.eq.f32.partialorder %v546_v27, 8.507059e+37 }
 0x2c0   : > { %v402_v12 = vmul.f32 %v1000_v7, %v401_v10 }
 0x2c2   : > { %v1002_v14 = vpop.eup %1001  ;;  %v445_v15 = vpop.xlane.xlu2 %444  ;;  %v403_v16 = vadd.f32 %v1000_v7, %v402_v12 }
 0x2c3   : > { %v538_v17 = vmul.f32 %v1002_v14, %v514_v8  ;;  %1003 = vrcp.f32 %v445_v15  ;;  %vm543_vm7 = vweird.f32 %v1002_v14  ;;  %v479_v39 = vand.u32 2147483648, %v445_v15  ;;  %v988_v8 = vld [vmem:[#allocation10] ss:$0 sm:$0xff] }
 0x2c4   : > { %v407_v19 = vsel %vm406_vm5, %v1000_v7, %v403_v16  ;;  %vm544_vm9 = vmor %vm542_vm8, %vm543_vm7  ;;  %vm473_vm12 = vweird.f32 %v445_v15  ;;  %v477_v41 = vand.u32 2147483647, %v445_v15  ;;  %vm634_vm5 = vcmask 130048  }
 0x2c5   : > { %v539_v20 = vsub.f32 1.0, %v538_v17  ;;  %v395_v21 = vpop.f32.mrf.mxu2  ;;  %v412_v22 = vsel %vm409_vm6, %v411_v18, %v407_v19  ;;  %v480_v43 = vor.u32 1.1754944e-38, %v479_v39  ;;  %vm636_vm6 = vcmask 195584  }
 0x2c6   : > { %v413_v23 = vmul.f32 %v412_v22, %v395_v21  ;;  %v533_v24 = vpop.f32.mrf.mxu1  ;;  %vm478_vm14 = vcmp.eq.f32.partialorder %v477_v41, 8.507059e+37 }
 0x2c7   : > { %v540_v26 = vmul.f32 %v1002_v14, %v539_v20 }
 0x2c8   : > { %630 = vrot.lane.b32.xlu0 %v413_v23, %s1254_s9 }
 0x2c9   : > { %v1004_v28 = vpop.eup %1003  ;;  %v541_v29 = vadd.f32 %v1002_v14, %v540_v26 }
 0x2ca   : > { %v469_v30 = vmul.f32 %v1004_v28, %v445_v15  ;;  %vm474_vm11 = vweird.f32 %v1004_v28 }
 0x2cb   : > { %v545_v32 = vsel %vm544_vm9, %v1002_v14, %v541_v29  ;;  %vm475_vm13 = vmor %vm473_vm12, %vm474_vm11  ;;  %v1257_v14 = vmov 32.0  }
 0x2cc   : > { %v470_v33 = vsub.f32 1.0, %v469_v30  ;;  %v550_v34 = vsel %vm547_vm10, %v549_v31, %v545_v32 }
 0x2cd   : > { %v551_v35 = vmul.f32 %v550_v34, %v533_v24  ;;  %v397_v36 = vpop.f32.mrf.mxu2  ;;  %v989_v34 = vld [vmem:[#allocation10 + $0x1] ss:$0 sm:$0xff] }
 0x2ce   : > { %v535_v37 = vpop.f32.mrf.mxu1  ;;  %v471_v38 = vmul.f32 %v1004_v28, %v470_v33 }
 0x2cf   : > { %622 = vrot.lane.b32.xlu2 %v551_v35, %s1255_s22  ;;  %v990_v37 = vld [vmem:[#allocation10 + $0x2] ss:$0 sm:$0xff] }
 0x2d0   : > { %v472_v40 = vadd.f32 %v1004_v28, %v471_v38 }
 0x2d2   : > { %v476_v42 = vsel %vm475_vm13, %v1004_v28, %v472_v40  ;;  %v583_v51 = vpop.xlane.xlu1 %582 }
 0x2d3   : > { %v481_v45 = vsel %vm478_vm14, %v480_v43, %v476_v42  ;;  %1005 = vrcp.f32 %v583_v51  ;;  %v617_v58 = vand.u32 2147483648, %v583_v51  ;;  %vm611_vm1 = vweird.f32 %v583_v51 }
 0x2d4   : > { %v615_v59 = vand.u32 2147483647, %v583_v51  ;;  %1007 = vrcp.f32 %v1257_v14 }
 0x2d5   : > { %v464_v44 = vpop.f32.mrf.mxu2  ;;  %v618_v61 = vor.u32 1.1754944e-38, %v617_v58 }
 0x2d6   : > { %v482_v46 = vmul.f32 %v481_v45, %v464_v44  ;;  %vm616_vm4 = vcmp.eq.f32.partialorder %v615_v59, 8.507059e+37 }
 0x2d8   : > { %626 = vrot.lane.b32.xlu1 %v482_v46, %s1256_s30 }
 0x2d9   : > { %v1006_v53 = vpop.eup %1005 }
 0x2da   : > { %v607_v54 = vmul.f32 %v1006_v53, %v583_v51  ;;  %vm612_vm15 = vweird.f32 %v1006_v53  ;;  %v1008_v15 = vpop.eup %1007 }
 0x2db   : > { %vm613_vm3 = vmor %vm611_vm1, %vm612_vm15  ;;  %v680_v16 = vmul.f32 32.0, %v1008_v15 }
 0x2dc   : > { %v608_v55 = vsub.f32 1.0, %v607_v54 }
 0x2dd   : > { %v466_v47 = vpop.f32.mrf.mxu2  ;;  %v681_v17 = vsub.f32 1.0, %v680_v16 }
 0x2de   : > { %v609_v56 = vmul.f32 %v1006_v53, %v608_v55 }
 0x2df   : > { %v682_v18 = vmul.f32 %v1008_v15, %v681_v17 }
 0x2e0   : > { %v610_v57 = vadd.f32 %v1006_v53, %v609_v56 }
 0x2e1   : > { %v683_v19 = vadd.f32 %v1008_v15, %v682_v18 }
 0x2e2   : > { %v614_v60 = vsel %vm613_vm3, %v1006_v53, %v610_v57 }
 0x2e3   : > { %v619_v62 = vsel %vm616_vm4, %v618_v61, %v614_v60 }
 0x2ed   : > { %v602_v48 = vpop.f32.mrf.mxu2 }
 0x2ee   : > { %v620_v0 = vmul.f32 %v619_v62, %v602_v48 }
 0x2f5   : > { %v604_v49 = vpop.f32.mrf.mxu2 }
 0x329   : > { %v623_v63 = vpop.permute.xlu2 %622 }
 0x32a   : > { %v633_v1 = vsel %vm347_vm2, %v620_v0, %v623_v63  ;;  %vm684_vm2 = vweird.f32 %v1008_v15 }
 0x32b   : > { %v685_v20 = vsel %vm684_vm2, %v1008_v15, %v683_v19 }
 0x33a   : > { %v631_v4 = vpop.permute.xlu0 %630 }
 0x34a   : > { %v627_v3 = vpop.permute.xlu1 %626 }
 0x34b   : > { %v635_v5 = vsel %vm634_vm5, %v633_v1, %v627_v3 }
 0x34c   : > { %v637_v6 = vsel %vm636_vm6, %v635_v5, %v631_v4 }
 0x34d   : > { %v638_v7 = vpack.c.bf16 %v637_v6, %v637_v6 }
 0x34f   : > { %875 = vmatmul.msk.bf16.vlgmr.msra.gmra.mxu0 %vm323_vm0, %v638_v7 }
 0x3cc   : > { %v671_v9 = vpop.f32.mrf.mxu0 }
 0x3cd   : > { %v672_v10 = vadd.f32 %v988_v8, %v671_v9 }
 0x3cf   : > { %v675_v11 = vadd.f32 %v672_v10, %v1424_v2 }
 0x3d1   : > { %v676_v12 = vsel %vm323_vm0, %v675_v11, 0.0 }
 0x3d2   : > { %677 = vadd.xlane.f32.xlu2 %v676_v12 }
 0x3d4   : > { %v673_v13 = vpop.f32.mrf.mxu0 }
 0x445   : > { %v678_v21 = vpop.xlane.xlu2 %677 }
 0x446   : > { %v686_v22 = vmul.f32 %v685_v20, %v678_v21 }
 0x448   : > { %v687_v23 = vsub.f32 %v675_v11, %v686_v22 }
 0x44a   : > { %v688_v24 = vmul.f32 %v687_v23, %v687_v23 }
 0x44c   : > { %v689_v2 = vsel %vm323_vm0, %v688_v24, 0.0 }
 0x44d   : > { %690 = vadd.xlane.f32.xlu0 %v689_v2 }
 0x4c0   : > { %v691_v25 = vpop.xlane.xlu0 %690 }
 0x4c1   : > { %v692_v26 = vmul.f32 %v691_v25, %v685_v20 }
 0x4c3   : > { %v693_v27 = vadd.f32 1e-05, %v692_v26 }
 0x4c5   : > { %1009 = vrsqrt.f32 %v693_v27  ;;  %vm700_vm8 = vweird.f32 %v693_v27 }
 0x4cb   : > { %v1010_v28 = vpop.eup %1009 }
 0x4cc   : > { %v695_v29 = vmul.f32 %v1010_v28, %v693_v27  ;;  %vm701_vm7 = vweird.f32 %v1010_v28 }
 0x4cd   : > { %vm702_vm9 = vmor %vm700_vm8, %vm701_vm7 }
 0x4ce   : > { %v696_v30 = vmul.f32 %v1010_v28, %v695_v29 }
 0x4d0   : > { %v697_v31 = vmul.f32 0.5, %v696_v30 }
 0x4d2   : > { %v698_v32 = vsub.f32 1.5, %v697_v31 }
 0x4d4   : > { %v699_v33 = vmul.f32 %v1010_v28, %v698_v32 }
 0x4d6   : > { %v703_v35 = vsel %vm702_vm9, %v1010_v28, %v699_v33 }
 0x4d7   : > { %v704_v36 = vmul.f32 %v703_v35, %v687_v23 }
 0x4d9   : > { %v706_v38 = vmul.f32 %v989_v34, %v704_v36 }
 0x4db   : > { %v708_v39 = vadd.f32 %v990_v37, %v706_v38 }
 0x4dd   : > { %709 = vst.msk [vmem:[%s303_s27] sm:$0xff] %vm323_vm0, %v708_v39 }
 0x4de   : > { %1188 = shalt.err (!%p1185_p9)
}
 0x4df   : > { %902 = dma.vmem_to_hbm [thread:$0]  (%p1375_p4), %s724_s28, 128, %s726_s6, %s711_s25  }
 0x4e0 PF: > { %s737_s10 = sand.u32 1, %s1223_s18   ;;  %p1520_p10 = scmp.ge.s32.totalorder %s1235_s21, 2 }
 0x4e1   : > { %s738_s30 = scalar_lea.sflag [#allocation4], %s737_s10 }
 0x4e2   : > { %p922_p13 = pnand %p1520_p10, %p1379_p6 }
 0x4e4   : > { %p923_p11 = pneg %p922_p13 }
 0x4e6   : > { %1218 = dma.done.wait (%p923_p11), %s738_s30, 128  }
 0x4e7   : > { %1220 = vsyncadd (%p923_p11), %s738_s30, 4294967168  ;;  %p20_p0 = scmp.ge.s32.totalorder %s1349_s29, 4   ;;  %s1521_s18 = smov %s1227_s19 }
 0x4e8   : > { %s1522_s19 = smov %s1231_s20  ;;  %s1523_s20 = smov %s1360_s8 }
 0x4e9   : > { %s1524_s21 = smov %s1349_s29  ;;  %22 = sbr.rel (!%p20_p0) target bundleno = 7 (0x7), region = 101 }
 0x4ee   :  { %744 = vsyncpa [#allocation3], 1 }
 0x4ef   :  { %746 = vsyncpa [#allocation3 + $0x1], 1 }
 0x4f0   :  { %747 = vsyncpa [#allocation6], 1 }
 0x4f1   :  { %748 = vsyncpa [#allocation9], 1 }
 0x4f2   :  { %749 = vsyncpa [#allocation4], 1 }
 0x4f3   :  { %751 = vsyncpa [#allocation4 + $0x1], 1 }

</bundles_post_ra>
